<compile_context>
chip_gen: v7x
topology: tpu7x:2x2x1
jax: 0.10.0
libtpu: 0.0.40
codegen_flags: <defaults>
</compile_context>

<pallas_src>
import jax
import jax.numpy as jnp
from jax.experimental import pallas as pl
from jax.experimental.pallas import tpu as pltpu


# ------------------------------ fused kernel --------------------------------

def _make_fused_kernel(n, hidden, out_dim, num_subgraphs, num_graphs, num_extra):
    """Builds the fused forward kernel (static shapes closed over)."""

    def kernel(a_ref, n2s_ref, s2g_ref,
               w1_ref, b1_ref, cw_ref, cb_ref,
               l1w_ref, l1b_ref, l2w_ref, l2b_ref, o_ref):
        a = a_ref[...]                                          # (N, N) f32

        # --- GCNConv(1, H) with x = ones([N,1]) folded to rank-1 form -------
        # A_hat @ (ones @ W1) + b1 == rowsum(A_hat)[:, None] * W1[0, :] + b1
        rowsum = jnp.sum(a, axis=1, keepdims=True)              # (N, 1)  XLU
        h = rowsum * w1_ref[...] + b1_ref[...]                  # (N, H)  VPU

        # --- remaining GCNConv(H, H) layers (unrolled, h stays in VMEM) -----
        for i in range(num_extra):
            xw = jnp.dot(h, cw_ref[i], preferred_element_type=jnp.float32)
            h = jnp.dot(a, xw, preferred_element_type=jnp.float32) + cb_ref[i]

        # --- global_add_pool(nodes -> subgraphs) ----------------------------
        # one-hot segment matrix built in-kernel (never touches HBM)
        p1 = (n2s_ref[...] ==
              jax.lax.broadcasted_iota(jnp.int32, (num_subgraphs, n), 0)
              ).astype(jnp.float32)                             # (S, N)
        hs = jnp.dot(p1, h, preferred_element_type=jnp.float32)  # (S, H)

        # --- global_add_pool(subgraphs -> graphs) ---------------------------
        p2 = (s2g_ref[...] ==
              jax.lax.broadcasted_iota(jnp.int32, (num_graphs, num_subgraphs), 0)
              ).astype(jnp.float32)                             # (G, S)
        hg = jnp.dot(p2, hs, preferred_element_type=jnp.float32)  # (G, H)

        # --- MLP head: relu(lin1) -> (eval dropout = id) -> lin2 ------------
        z = jnp.maximum(
            jnp.dot(hg, l1w_ref[...], preferred_element_type=jnp.float32)
            + l1b_ref[...], 0.0)
        logits = (jnp.dot(z, l2w_ref[...], preferred_element_type=jnp.float32)
                  + l2b_ref[...])                               # (G, OUT)

        # --- log_softmax along last dim --------------------------------------
        m = jnp.max(logits, axis=-1, keepdims=True)
        lse = jnp.log(jnp.sum(jnp.exp(logits - m), axis=-1, keepdims=True)) + m
        o_ref[...] = logits - lse

    return kernel


def nested_gcn_forward(a_hat, node_to_subgraph, subgraph_to_graph, params,
                       num_subgraphs, num_graphs):
    n = a_hat.shape[0]
    hidden = params["conv1_w"].shape[1]
    out_dim = params["lin2_w"].shape[1]
    convs_w = params["convs_w"]                  # (L-1, H, H)
    convs_b = params["convs_b"]                  # (L-1, 1, H)
    num_extra = int(convs_w.shape[0])
    if num_extra == 0:                           # keep pallas inputs non-empty
        convs_w = jnp.zeros((1, hidden, hidden), jnp.float32)
        convs_b = jnp.zeros((1, 1, hidden), jnp.float32)

    n2s = node_to_subgraph.reshape(1, n).astype(jnp.int32)
    s2g = subgraph_to_graph.reshape(1, num_subgraphs).astype(jnp.int32)

    kernel = _make_fused_kernel(n, hidden, out_dim,
                                num_subgraphs, num_graphs, num_extra)

    vmem = pl.BlockSpec(memory_space=pltpu.MemorySpace.VMEM)
    return pl.pallas_call(
        kernel,
        out_shape=jax.ShapeDtypeStruct((num_graphs, out_dim), jnp.float32),
        in_specs=[vmem] * 11,
        out_specs=vmem,
    )(a_hat, n2s, s2g,
      params["conv1_w"], params["conv1_b"], convs_w, convs_b,
      params["lin1_w"], params["lin1_b"], params["lin2_w"], params["lin2_b"])


# --------------------------- pure-JAX reference ------------------------------

def nested_gcn_reference(a_hat, node_to_subgraph, subgraph_to_graph, params,
                         num_subgraphs, num_graphs):
    n = a_hat.shape[0]
    x = jnp.ones((n, 1), jnp.float32)
    h = a_hat @ (x @ params["conv1_w"]) + params["conv1_b"]
    for i in range(params["convs_w"].shape[0]):
        h = a_hat @ (h @ params["convs_w"][i]) + params["convs_b"][i]
    p1 = (node_to_subgraph[None, :] ==
          jnp.arange(num_subgraphs)[:, None]).astype(jnp.float32)
    p2 = (subgraph_to_graph[None, :] ==
          jnp.arange(num_graphs)[:, None]).astype(jnp.float32)
    h = p2 @ (p1 @ h)
    h = jnp.maximum(h @ params["lin1_w"] + params["lin1_b"], 0.0)
    logits = h @ params["lin2_w"] + params["lin2_b"]
    return jax.nn.log_softmax(logits, axis=-1)


# ------------------------------------ main -----------------------------------

if __name__ == "__main__":
    jax.config.update("jax_default_matmul_precision", "highest")

    NUM_LAYERS = 3          # conv1 + 2 extra GCNConv layers
    HIDDEN = 32
    OUTPUT_DIM = 16
    NUM_GRAPHS = 2
    SUBGRAPHS_PER_GRAPH = 4
    NODES_PER_SUBGRAPH = 3
    S = NUM_GRAPHS * SUBGRAPHS_PER_GRAPH               # 8 subgraphs
    N = S * NODES_PER_SUBGRAPH                         # 24 nodes

    key = jax.random.PRNGKey(0)
    k_adj, k_c1w, k_c1b, k_cw, k_cb, k_l1w, k_l1b, k_l2w, k_l2b = (
        jax.random.split(key, 9)
    )

    # --- synthetic graph: symmetric 0/1 adjacency, no self loops ---
    adj_rand = jax.random.bernoulli(k_adj, p=0.3, shape=(N, N)).astype(jnp.float32)
    adj = jnp.maximum(adj_rand, adj_rand.T)
    adj = adj * (1.0 - jnp.eye(N, dtype=jnp.float32))

    # gcn_norm with self loops: A_hat = D^{-1/2} (A + I) D^{-1/2}
    a_tilde = adj + jnp.eye(N, dtype=jnp.float32)
    deg = jnp.sum(a_tilde, axis=1)
    d_inv_sqrt = 1.0 / jnp.sqrt(deg)
    a_hat = d_inv_sqrt[:, None] * a_tilde * d_inv_sqrt[None, :]

    # --- pooling assignments (segment ids; one-hots are built in-kernel) ---
    node_to_subgraph = jnp.repeat(jnp.arange(S), NODES_PER_SUBGRAPH)        # (N,)
    subgraph_to_graph = jnp.repeat(jnp.arange(NUM_GRAPHS), SUBGRAPHS_PER_GRAPH)

    # --- deterministic parameters (weights stored as (in, out)) ---
    cw_keys = jax.random.split(k_cw, NUM_LAYERS - 1)
    cb_keys = jax.random.split(k_cb, NUM_LAYERS - 1)
    params = {
        "conv1_w": 0.1 * jax.random.normal(k_c1w, (1, HIDDEN), jnp.float32),
        "conv1_b": 0.1 * jax.random.normal(k_c1b, (1, HIDDEN), jnp.float32),
        "convs_w": jnp.stack([
            0.1 * jax.random.normal(cw_keys[i], (HIDDEN, HIDDEN), jnp.float32)
            for i in range(NUM_LAYERS - 1)]),
        "convs_b": jnp.stack([
            0.1 * jax.random.normal(cb_keys[i], (1, HIDDEN), jnp.float32)
            for i in range(NUM_LAYERS - 1)]),
        "lin1_w": 0.1 * jax.random.normal(k_l1w, (HIDDEN, HIDDEN), jnp.float32),
        "lin1_b": 0.1 * jax.random.normal(k_l1b, (1, HIDDEN), jnp.float32),
        "lin2_w": 0.1 * jax.random.normal(k_l2w, (HIDDEN, OUTPUT_DIM), jnp.float32),
        "lin2_b": 0.1 * jax.random.normal(k_l2b, (1, OUTPUT_DIM), jnp.float32),
    }

    out = nested_gcn_forward(a_hat, node_to_subgraph, subgraph_to_graph,
                             params, S, NUM_GRAPHS)
    out = jax.block_until_ready(out)

    # --- checks -------------------------------------------------------------
    assert out.shape == (NUM_GRAPHS, OUTPUT_DIM)
    assert bool(jnp.all(jnp.isfinite(out)))
    # rows of log_softmax must sum to ~1 in prob space
    assert bool(jnp.all(jnp.abs(jnp.sum(jnp.exp(out), axis=-1) - 1.0) < 1e-4))
    # pure-JAX reference (independent math path: un-folded first layer)
    ref = nested_gcn_reference(a_hat, node_to_subgraph, subgraph_to_graph,
                               params, S, NUM_GRAPHS)
    assert bool(jnp.all(jnp.abs(out - ref) <= 1e-2 + 1e-2 * jnp.abs(ref)))

    print("KERNEL_OK")
</pallas_src>

<mosaic_0001>
module attributes {stable_mosaic.version = 11 : i64} {
  func.func @kernel(%arg0: memref<24x24xf32, #tpu.memory_space<vmem>>, %arg1: memref<1x24xi32, #tpu.memory_space<vmem>>, %arg2: memref<1x8xi32, #tpu.memory_space<vmem>>, %arg3: memref<1x32xf32, #tpu.memory_space<vmem>>, %arg4: memref<1x32xf32, #tpu.memory_space<vmem>>, %arg5: memref<2x32x32xf32, #tpu.memory_space<vmem>>, %arg6: memref<2x1x32xf32, #tpu.memory_space<vmem>>, %arg7: memref<32x32xf32, #tpu.memory_space<vmem>>, %arg8: memref<1x32xf32, #tpu.memory_space<vmem>>, %arg9: memref<32x16xf32, #tpu.memory_space<vmem>>, %arg10: memref<1x16xf32, #tpu.memory_space<vmem>>, %arg11: memref<2x16xf32, #tpu.memory_space<vmem>>) attributes {dimension_semantics = [], scalar_prefetch = 0 : i64, scratch_operands = 0 : i64, tpu.core_type = #tpu.core_type<tc>} {
    %c0 = arith.constant 0 : index
    %c0_0 = arith.constant 0 : index
    %0 = vector.load %arg0[%c0, %c0_0] : memref<24x24xf32, #tpu.memory_space<vmem>>, vector<24x24xf32>
    %cst = arith.constant dense<0.000000e+00> : vector<24xf32>
    %1 = vector.multi_reduction <add>, %0, %cst [1] : vector<24x24xf32> to vector<24xf32>
    %2 = vector.shape_cast %1 : vector<24xf32> to vector<24x1xf32>
    %c0_1 = arith.constant 0 : index
    %c0_2 = arith.constant 0 : index
    %3 = vector.load %arg3[%c0_1, %c0_2] : memref<1x32xf32, #tpu.memory_space<vmem>>, vector<1x32xf32>
    %4 = vector.broadcast %2 : vector<24x1xf32> to vector<24x32xf32>
    %5 = vector.broadcast %3 : vector<1x32xf32> to vector<24x32xf32>
    %6 = arith.mulf %4, %5 : vector<24x32xf32>
    %c0_3 = arith.constant 0 : index
    %c0_4 = arith.constant 0 : index
    %7 = vector.load %arg4[%c0_3, %c0_4] : memref<1x32xf32, #tpu.memory_space<vmem>>, vector<1x32xf32>
    %8 = vector.broadcast %7 : vector<1x32xf32> to vector<24x32xf32>
    %9 = arith.addf %6, %8 : vector<24x32xf32>
    %c0_5 = arith.constant 0 : index
    %c0_6 = arith.constant 0 : index
    %c0_7 = arith.constant 0 : index
    %10 = vector.load %arg5[%c0_5, %c0_6, %c0_7] : memref<2x32x32xf32, #tpu.memory_space<vmem>>, vector<1x32x32xf32>
    %11 = vector.shape_cast %10 : vector<1x32x32xf32> to vector<32x32xf32>
    %cst_8 = arith.constant dense<0.000000e+00> : vector<24x32xf32>
    %12 = tpu.matmul %9, %11, %cst_8 {dimension_numbers = #tpu.dot_dimension_numbers<[1], [0], [0], [1], [0, 0, 1, 1], [], []>, precision = #tpu.contract_precision<fp32>} : vector<24x32xf32>, vector<32x32xf32>, vector<24x32xf32> -> vector<24x32xf32>
    %cst_9 = arith.constant dense<0.000000e+00> : vector<24x32xf32>
    %13 = tpu.matmul %0, %12, %cst_9 {dimension_numbers = #tpu.dot_dimension_numbers<[1], [0], [0], [1], [0, 0, 1, 1], [], []>, precision = #tpu.contract_precision<fp32>} : vector<24x24xf32>, vector<24x32xf32>, vector<24x32xf32> -> vector<24x32xf32>
    %c0_10 = arith.constant 0 : index
    %c0_11 = arith.constant 0 : index
    %c0_12 = arith.constant 0 : index
    %14 = vector.load %arg6[%c0_10, %c0_11, %c0_12] : memref<2x1x32xf32, #tpu.memory_space<vmem>>, vector<1x1x32xf32>
    %15 = vector.shape_cast %14 : vector<1x1x32xf32> to vector<1x32xf32>
    %16 = vector.broadcast %15 : vector<1x32xf32> to vector<24x32xf32>
    %17 = arith.addf %13, %16 : vector<24x32xf32>
    %c1 = arith.constant 1 : index
    %c0_13 = arith.constant 0 : index
    %c0_14 = arith.constant 0 : index
    %18 = vector.load %arg5[%c1, %c0_13, %c0_14] : memref<2x32x32xf32, #tpu.memory_space<vmem>>, vector<1x32x32xf32>
    %19 = vector.shape_cast %18 : vector<1x32x32xf32> to vector<32x32xf32>
    %cst_15 = arith.constant dense<0.000000e+00> : vector<24x32xf32>
    %20 = tpu.matmul %17, %19, %cst_15 {dimension_numbers = #tpu.dot_dimension_numbers<[1], [0], [0], [1], [0, 0, 1, 1], [], []>, precision = #tpu.contract_precision<fp32>} : vector<24x32xf32>, vector<32x32xf32>, vector<24x32xf32> -> vector<24x32xf32>
    %cst_16 = arith.constant dense<0.000000e+00> : vector<24x32xf32>
    %21 = tpu.matmul %0, %20, %cst_16 {dimension_numbers = #tpu.dot_dimension_numbers<[1], [0], [0], [1], [0, 0, 1, 1], [], []>, precision = #tpu.contract_precision<fp32>} : vector<24x24xf32>, vector<24x32xf32>, vector<24x32xf32> -> vector<24x32xf32>
    %c1_17 = arith.constant 1 : index
    %c0_18 = arith.constant 0 : index
    %c0_19 = arith.constant 0 : index
    %22 = vector.load %arg6[%c1_17, %c0_18, %c0_19] : memref<2x1x32xf32, #tpu.memory_space<vmem>>, vector<1x1x32xf32>
    %23 = vector.shape_cast %22 : vector<1x1x32xf32> to vector<1x32xf32>
    %24 = vector.broadcast %23 : vector<1x32xf32> to vector<24x32xf32>
    %25 = arith.addf %21, %24 : vector<24x32xf32>
    %c0_20 = arith.constant 0 : index
    %c0_21 = arith.constant 0 : index
    %26 = vector.load %arg1[%c0_20, %c0_21] : memref<1x24xi32, #tpu.memory_space<vmem>>, vector<1x24xi32>
    %27 = tpu.iota {dimensions = array<i32: 0>} : vector<8x24xi32>
    %28 = vector.broadcast %26 : vector<1x24xi32> to vector<8x24xi32>
    %29 = arith.cmpi eq, %28, %27 : vector<8x24xi32>
    %30 = arith.extui %29 : vector<8x24xi1> to vector<8x24xi32>
    %31 = arith.sitofp %30 : vector<8x24xi32> to vector<8x24xf32>
    %cst_22 = arith.constant dense<0.000000e+00> : vector<8x32xf32>
    %32 = tpu.matmul %31, %25, %cst_22 {dimension_numbers = #tpu.dot_dimension_numbers<[1], [0], [0], [1], [0, 0, 1, 1], [], []>, precision = #tpu.contract_precision<fp32>} : vector<8x24xf32>, vector<24x32xf32>, vector<8x32xf32> -> vector<8x32xf32>
    %c0_23 = arith.constant 0 : index
    %c0_24 = arith.constant 0 : index
    %33 = vector.load %arg2[%c0_23, %c0_24] : memref<1x8xi32, #tpu.memory_space<vmem>>, vector<1x8xi32>
    %34 = tpu.iota {dimensions = array<i32: 0>} : vector<2x8xi32>
    %35 = vector.broadcast %33 : vector<1x8xi32> to vector<2x8xi32>
    %36 = arith.cmpi eq, %35, %34 : vector<2x8xi32>
    %37 = arith.extui %36 : vector<2x8xi1> to vector<2x8xi32>
    %38 = arith.sitofp %37 : vector<2x8xi32> to vector<2x8xf32>
    %cst_25 = arith.constant dense<0.000000e+00> : vector<2x32xf32>
    %39 = tpu.matmul %38, %32, %cst_25 {dimension_numbers = #tpu.dot_dimension_numbers<[1], [0], [0], [1], [0, 0, 1, 1], [], []>, precision = #tpu.contract_precision<fp32>} : vector<2x8xf32>, vector<8x32xf32>, vector<2x32xf32> -> vector<2x32xf32>
    %c0_26 = arith.constant 0 : index
    %c0_27 = arith.constant 0 : index
    %40 = vector.load %arg7[%c0_26, %c0_27] : memref<32x32xf32, #tpu.memory_space<vmem>>, vector<32x32xf32>
    %cst_28 = arith.constant dense<0.000000e+00> : vector<2x32xf32>
    %41 = tpu.matmul %39, %40, %cst_28 {dimension_numbers = #tpu.dot_dimension_numbers<[1], [0], [0], [1], [0, 0, 1, 1], [], []>, precision = #tpu.contract_precision<fp32>} : vector<2x32xf32>, vector<32x32xf32>, vector<2x32xf32> -> vector<2x32xf32>
    %c0_29 = arith.constant 0 : index
    %c0_30 = arith.constant 0 : index
    %42 = vector.load %arg8[%c0_29, %c0_30] : memref<1x32xf32, #tpu.memory_space<vmem>>, vector<1x32xf32>
    %43 = vector.broadcast %42 : vector<1x32xf32> to vector<2x32xf32>
    %44 = arith.addf %41, %43 : vector<2x32xf32>
    %cst_31 = arith.constant 0.000000e+00 : f32
    %45 = vector.broadcast %cst_31 : f32 to vector<2x32xf32>
    %46 = arith.maximumf %44, %45 : vector<2x32xf32>
    %c0_32 = arith.constant 0 : index
    %c0_33 = arith.constant 0 : index
    %47 = vector.load %arg9[%c0_32, %c0_33] : memref<32x16xf32, #tpu.memory_space<vmem>>, vector<32x16xf32>
    %cst_34 = arith.constant dense<0.000000e+00> : vector<2x16xf32>
    %48 = tpu.matmul %46, %47, %cst_34 {dimension_numbers = #tpu.dot_dimension_numbers<[1], [0], [0], [1], [0, 0, 1, 1], [], []>, precision = #tpu.contract_precision<fp32>} : vector<2x32xf32>, vector<32x16xf32>, vector<2x16xf32> -> vector<2x16xf32>
    %c0_35 = arith.constant 0 : index
    %c0_36 = arith.constant 0 : index
    %49 = vector.load %arg10[%c0_35, %c0_36] : memref<1x16xf32, #tpu.memory_space<vmem>>, vector<1x16xf32>
    %50 = vector.broadcast %49 : vector<1x16xf32> to vector<2x16xf32>
    %51 = arith.addf %48, %50 : vector<2x16xf32>
    %cst_37 = arith.constant dense<0xFF800000> : vector<2xf32>
    %52 = vector.multi_reduction <maximumf>, %51, %cst_37 [1] : vector<2x16xf32> to vector<2xf32>
    %53 = vector.shape_cast %52 : vector<2xf32> to vector<2x1xf32>
    %54 = vector.broadcast %53 : vector<2x1xf32> to vector<2x16xf32>
    %55 = arith.subf %51, %54 : vector<2x16xf32>
    %56 = math.exp %55 : vector<2x16xf32>
    %cst_38 = arith.constant dense<0.000000e+00> : vector<2xf32>
    %57 = vector.multi_reduction <add>, %56, %cst_38 [1] : vector<2x16xf32> to vector<2xf32>
    %58 = vector.shape_cast %57 : vector<2xf32> to vector<2x1xf32>
    %59 = math.log %58 : vector<2x1xf32>
    %60 = arith.addf %59, %53 : vector<2x1xf32>
    %61 = vector.broadcast %60 : vector<2x1xf32> to vector<2x16xf32>
    %62 = arith.subf %51, %61 : vector<2x16xf32>
    %c0_39 = arith.constant 0 : index
    %c0_40 = arith.constant 0 : index
    %63 = vector.load %arg11[%c0_39, %c0_40] : memref<2x16xf32, #tpu.memory_space<vmem>>, vector<2x16xf32>
    tpu.vector_store %arg11[%c0_39, %c0_40], %62 {strides = array<i32>} : memref<2x16xf32, #tpu.memory_space<vmem>>, vector<2x16xf32>,
    return
  }
}

</mosaic_0001>

<bundles_post_ra>
// kernel: tpu_custom_call.1
= control target key start
LH: loop header
LB: loop body
LE: loop exit
PB: predicated region body
PF: predicated region fallthrough
CT: control target
= control target key end

     0   :  { %16 = vsyncpa [#allocation3], 0  ;;  %s6617_s0 = inlined_call_operand.hbm [shape: f32[24,24], index: 0, kind: input, shape index: {}]   ;;  %s6618_s1 = inlined_call_operand.hbm [shape: s32[1,24], index: 1, kind: input, shape index: {}]   ;;  %s6619_s2 = inlined_call_operand.hbm [shape: s32[1,8], index: 2, kind: input, shape index: {}]   ;;  %s6620_s3 = inlined_call_operand.hbm [shape: f32[1,32], index: 3, kind: input, shape index: {}]   ;;  %s6621_s4 = inlined_call_operand.hbm [shape: f32[1,32], index: 4, kind: input, shape index: {}]   ;;  %s6622_s5 = inlined_call_operand.vmem [shape: f32[2,32,32], index: 5, kind: input, shape index: {}]   ;;  %s6623_s6 = inlined_call_operand.vmem [shape: f32[2,1,32], index: 6, kind: input, shape index: {}]   ;;  %s6624_s7 = inlined_call_operand.hbm [shape: f32[32,32], index: 7, kind: input, shape index: {}]   ;;  %s6625_s8 = inlined_call_operand.hbm [shape: f32[1,32], index: 8, kind: input, shape index: {}]   ;;  %s6626_s9 = inlined_call_operand.vmem [shape: f32[32,16], index: 9, kind: input, shape index: {}]   ;;  %s6627_s10 = inlined_call_operand.vmem [shape: f32[1,16], index: 10, kind: input, shape index: {}]   ;;  %s6628_s11 = inlined_call_operand.hbm [shape: f32[2,16], index: 11, kind: output, shape index: {}]  }
   0x1   :  { %17 = vsyncpa [#allocation6], 0 }
   0x2   :  { %18 = vsyncpa [#allocation9], 0 }
   0x3   :  { %19 = vsyncpa [#allocation12], 0 }
   0x4   :  { %20 = vsyncpa [#allocation4], 0  ;;  %s5883_s17 = smov [#allocation5]   ;;  %s5884_s19 = smov [#allocation8]  }
   0x5   :  { %s39_s18 = sshll.u32 %s5883_s17, 4  ;;  %s59_s20 = sshll.u32 %s5884_s19, 4  ;;  %s40_s18 = int_to_ptr.vmem [resolvable:$true] %s39_s18  ;;  %s60_s20 = int_to_ptr.vmem [resolvable:$true] %s59_s20 }
   0x6   :  { %s5697_s23 = scalar_lea.hbm %s6618_s1, 16 }
   0x7   :  { %p5698_p0 = scmp.ne.s32.totalorder %s6618_s1, %s5697_s23  ;;  %p5701_p1 = scmp.lt.u32.totalorder %s5697_s23, %s6618_s1 }
   0x9   :  { %p5703_p2 = pnand %p5701_p1, %p5698_p0 }
   0xb   :  { %5706 = shalt.err (!%p5703_p2)
}
   0xc   :  { %s5707_s28 = scalar_lea.vmem %s40_s18, 16  ;;  %s5711_s29 = scalar_lea.vmem %s40_s18, 32 }
   0xd   :  { %p5708_p3 = scmp.ne.s32.totalorder %s40_s18, %s5707_s28  ;;  %p5712_p4 = scmp.lt.s32.totalorder %s40_s18, %s40_s18 }
   0xe   :  { %p5713_p5 = scmp.lt.s32.totalorder %s5711_s29, %s5707_s28 }
  0x10   :  { %p5714_p6 = por %p5713_p5, %p5712_p4 }
  0x12   :  { %p5715_p7 = pnand %p5714_p6, %p5708_p3 }
  0x14   :  { %5718 = shalt.err (!%p5715_p7)
}
  0x15   :  { %42 = dma.hbm_to_vmem [thread:$0]  %s6618_s1, 16, %s40_s18, [#allocation6]  }
  0x16   :  { %s5719_s15 = scalar_lea.hbm %s6620_s3, 16 }
  0x17   :  { %p5720_p8 = scmp.ne.s32.totalorder %s6620_s3, %s5719_s15  ;;  %p5723_p9 = scmp.lt.u32.totalorder %s5719_s15, %s6620_s3 }
  0x19   :  { %p5725_p10 = pnand %p5723_p9, %p5720_p8 }
  0x1b   :  { %5728 = shalt.err (!%p5725_p10)
}
  0x1c   :  { %s5729_s22 = scalar_lea.vmem %s60_s20, 16  ;;  %s5733_s23 = scalar_lea.vmem %s60_s20, 32 }
  0x1d   :  { %p5730_p11 = scmp.ne.s32.totalorder %s60_s20, %s5729_s22  ;;  %p5734_p12 = scmp.lt.s32.totalorder %s60_s20, %s60_s20 }
  0x1e   :  { %p5735_p13 = scmp.lt.s32.totalorder %s5733_s23, %s5729_s22 }
  0x20   :  { %p5736_p0 = por %p5735_p13, %p5734_p12 }
  0x22   :  { %p5737_p1 = pnand %p5736_p0, %p5730_p11 }
  0x24   :  { %5740 = shalt.err (!%p5737_p1)
}
  0x25   :  { %62 = dma.hbm_to_vmem [thread:$0]  %s6620_s3, 16, %s60_s20, [#allocation9]  }
  0x26   :  { %s5885_s24 = smov [#allocation11]   ;;  %s5886_s26 = smov [#allocation2]  }
  0x27   :  { %s82_s25 = sshll.u32 %s5885_s24, 4  ;;  %s26_s27 = sshll.u32 %s5886_s26, 4  ;;  %s83_s25 = int_to_ptr.vmem [resolvable:$true] %s82_s25  ;;  %s5980_s27 = int_to_ptr.vmem [resolvable:$true] %s26_s27 }
  0x28   :  { %s5741_s30 = scalar_lea.hbm %s6624_s7, 512 }
  0x29   :  { %p5742_p2 = scmp.ne.s32.totalorder %s6624_s7, %s5741_s30  ;;  %p5745_p3 = scmp.lt.u32.totalorder %s5741_s30, %s6624_s7 }
  0x2b   :  { %p5747_p4 = pnand %p5745_p3, %p5742_p2 }
  0x2d   :  { %5750 = shalt.err (!%p5747_p4)
}
  0x2e   :  { %s5751_s3 = scalar_lea.vmem %s83_s25, 512  ;;  %p5756_p6 = scmp.lt.s32.totalorder %s83_s25, %s83_s25 }
  0x2f   :  { %p5752_p5 = scmp.ne.s32.totalorder %s83_s25, %s5751_s3  ;;  %p5757_p7 = scmp.lt.s32.totalorder %s5751_s3, %s5751_s3 }
  0x31   :  { %p5758_p8 = por %p5757_p7, %p5756_p6 }
  0x33   :  { %p5759_p9 = pnand %p5758_p8, %p5752_p5 }
  0x35   :  { %5762 = shalt.err (!%p5759_p9)
}
  0x36   :  { %s5887_s20 = smov 128   ;;  %s5888_s16 = smov 8  }
  0x37   :  { %88 = dma.hbm_to_vmem [thread:$0]  %s6624_s7, 512, %s83_s25, [#allocation12], %s5887_s20, %s5887_s20, %s5888_s16  }
  0x38   :  { %s5763_s23 = scalar_lea.hbm %s6617_s0, 384 }
  0x39   :  { %p5764_p10 = scmp.ne.s32.totalorder %s6617_s0, %s5763_s23  ;;  %p5767_p11 = scmp.lt.u32.totalorder %s5763_s23, %s6617_s0 }
  0x3b   :  { %p5769_p12 = pnand %p5767_p11, %p5764_p10 }
  0x3d   :  { %5772 = shalt.err (!%p5769_p12)
}
  0x3e   :  { %s5773_s28 = scalar_lea.vmem %s5980_s27, 384  ;;  %p5778_p0 = scmp.lt.s32.totalorder %s5980_s27, %s5980_s27 }
  0x3f   :  { %p5774_p13 = scmp.ne.s32.totalorder %s5980_s27, %s5773_s28  ;;  %p5779_p1 = scmp.lt.s32.totalorder %s5773_s28, %s5773_s28 }
  0x41   :  { %p5780_p2 = por %p5779_p1, %p5778_p0 }
  0x43   :  { %p5781_p3 = pnand %p5780_p2, %p5774_p13 }
  0x45   :  { %5784 = shalt.err (!%p5781_p3)
}
  0x46   :  { %32 = dma.hbm_to_vmem [thread:$0]  %s6617_s0, 384, %s5980_s27, [#allocation3], %s5887_s20, %s5887_s20, %s5888_s16  }
  0x47   :  { %s5889_s29 = smov [#allocation7]   ;;  %s5890_s12 = smov [#allocation10]  }
  0x48   :  { %s49_s30 = sshll.u32 %s5889_s29, 4  ;;  %s69_s13 = sshll.u32 %s5890_s12, 4  ;;  %s50_s30 = int_to_ptr.vmem [resolvable:$true] %s49_s30  ;;  %s70_s13 = int_to_ptr.vmem [resolvable:$true] %s69_s13 }
  0x49   :  { %s5785_s3 = scalar_lea.hbm %s6619_s2, 16 }
  0x4a   :  { %p5786_p4 = scmp.ne.s32.totalorder %s6619_s2, %s5785_s3  ;;  %p5789_p5 = scmp.lt.u32.totalorder %s5785_s3, %s6619_s2 }
  0x4c   :  { %p5791_p6 = pnand %p5789_p5, %p5786_p4 }
  0x4e   :  { %5794 = shalt.err (!%p5791_p6)
}
  0x4f   :  { %s5795_s0 = scalar_lea.vmem %s50_s30, 16  ;;  %s5799_s27 = scalar_lea.vmem %s50_s30, 32 }
  0x50   :  { %p5796_p7 = scmp.ne.s32.totalorder %s50_s30, %s5795_s0  ;;  %p5800_p8 = scmp.lt.s32.totalorder %s50_s30, %s50_s30 }
  0x51   :  { %p5801_p9 = scmp.lt.s32.totalorder %s5799_s27, %s5795_s0 }
  0x53   :  { %p5802_p10 = por %p5801_p9, %p5800_p8 }
  0x55   :  { %p5803_p11 = pnand %p5802_p10, %p5796_p7 }
  0x57   :  { %5806 = shalt.err (!%p5803_p11)
}
  0x58   :  { %52 = dma.hbm_to_vmem [thread:$0]  %s6619_s2, 16, %s50_s30, [#allocation6]  }
  0x59   :  { %s5807_s18 = scalar_lea.hbm %s6621_s4, 16 }
  0x5a   :  { %p5808_p12 = scmp.ne.s32.totalorder %s6621_s4, %s5807_s18  ;;  %p5811_p13 = scmp.lt.u32.totalorder %s5807_s18, %s6621_s4 }
  0x5c   :  { %p5813_p0 = pnand %p5811_p13, %p5808_p12 }
  0x5e   :  { %5816 = shalt.err (!%p5813_p0)
}
  0x5f   :  { %s5817_s25 = scalar_lea.vmem %s70_s13, 16  ;;  %s5821_s29 = scalar_lea.vmem %s70_s13, 32 }
  0x60   :  { %p5818_p1 = scmp.ne.s32.totalorder %s70_s13, %s5817_s25  ;;  %p5822_p2 = scmp.lt.s32.totalorder %s70_s13, %s70_s13 }
  0x61   :  { %p5823_p3 = scmp.lt.s32.totalorder %s5821_s29, %s5817_s25 }
  0x63   :  { %p5824_p4 = por %p5823_p3, %p5822_p2 }
  0x65   :  { %p5825_p5 = pnand %p5824_p4, %p5818_p1 }
  0x67   :  { %5828 = shalt.err (!%p5825_p5)
}
  0x68   :  { %72 = dma.hbm_to_vmem [thread:$0]  %s6621_s4, 16, %s70_s13, [#allocation9]  }
  0x69   :  { %s5891_s12 = smov [#allocation13]   ;;  %s5829_s17 = scalar_lea.hbm %s6625_s8, 16 }
  0x6a   :  { %s95_s14 = sshll.u32 %s5891_s12, 4  ;;  %p5830_p6 = scmp.ne.s32.totalorder %s6625_s8, %s5829_s17  ;;  %s96_s14 = int_to_ptr.vmem [resolvable:$true] %s95_s14 }
  0x6b   :  { %p5833_p7 = scmp.lt.u32.totalorder %s5829_s17, %s6625_s8 }
  0x6d   :  { %p5835_p8 = pnand %p5833_p7, %p5830_p6 }
  0x6f   :  { %5838 = shalt.err (!%p5835_p8)
}
  0x70   :  { %s5839_s27 = scalar_lea.vmem %s96_s14, 16  ;;  %s5843_s4 = scalar_lea.vmem %s96_s14, 32 }
  0x71   :  { %p5840_p9 = scmp.ne.s32.totalorder %s96_s14, %s5839_s27  ;;  %p5844_p10 = scmp.lt.s32.totalorder %s96_s14, %s96_s14 }
  0x72   :  { %p5845_p11 = scmp.lt.s32.totalorder %s5843_s4, %s5839_s27 }
  0x74   :  { %p5846_p12 = por %p5845_p11, %p5844_p10 }
  0x76   :  { %p5847_p13 = pnand %p5846_p12, %p5840_p9 }
  0x78   :  { %5850 = shalt.err (!%p5847_p13)
}
  0x79   :  { %98 = dma.hbm_to_vmem [thread:$0]  %s6625_s8, 16, %s96_s14, [#allocation12]  }
  0x7a   :  { %5873 = dma.done.wait [#allocation3], 384  }
  0x7b   :  { %5874 = vsyncadd [#allocation3], 4294966912 }
  0x7c   :  { %5875 = dma.done.wait [#allocation6], 32  }
  0x7d   :  { %5876 = vsyncadd [#allocation6], 4294967264 }
  0x7e   :  { %5877 = dma.done.wait [#allocation9], 32  }
  0x7f   :  { %5878 = vsyncadd [#allocation9], 4294967264 }
  0x80   :  { %5879 = dma.done.wait [#allocation12], 528  }
  0x81   :  { %5880 = vsyncadd [#allocation12], 4294966768  ;;  %vm127_vm0 = vcmask 195584   ;;  %v6047_v0 = vld [vmem:[#allocation2] sm:$0xff]  ;;  %v6049_v1 = vld [vmem:[#allocation2 + $0x10] sm:$0xff]  ;;  %v5892_v11 = vmov 0.0|0.0  }
  0x82   :  { %v6051_v2 = vld [vmem:[#allocation2 + $0x8] sm:$0xff]  ;;  %v128_v3 = vsel %vm127_vm0, %v6047_v0, 0.0  ;;  %v134_v4 = vsel %vm127_vm0, %v6049_v1, 0.0  ;;  %v157_v6 = vld [vmem:[%s6622_s5] sm:$0xff]  ;;  %5315 = vmatprep.subr.bf16.mxu0 %v5892_v11  ;;  %v159_v12 = vld [vmem:[%s6622_s5 + $0x10] sm:$0xff]  ;;  %5351 = vmatprep.subr.bf16.mxu1 %v5892_v11  ;;  %vm5893_vm1 = vmmov 0  }
  0x83   :  { %129 = vadd.xlane.f32.xlu0 %v128_v3  ;;  %135 = vadd.xlane.f32.xlu1 %v134_v4  ;;  %v131_v5 = vsel %vm127_vm0, %v6051_v2, 0.0  ;;  %v158_v7 = vld [vmem:[%s6622_s5 + $0x8] sm:$0xff]  ;;  %v172_v8 = vand.u32 4294901760, %v157_v6  ;;  %v160_v13 = vld [vmem:[%s6622_s5 + $0x18] sm:$0xff]  ;;  %v178_v14 = vand.u32 4294901760, %v159_v12  ;;  %v5894_v21 = vmov 0.0  }
  0x84   :  { %v175_v9 = vand.u32 4294901760, %v158_v7  ;;  %v181_v15 = vand.u32 4294901760, %v160_v13  ;;  %4723 = vmatprep.mubr.msk.f32.mxu0 %vm5893_vm1, %v5894_v21  ;;  %4823 = vmatprep.mubr.msk.f32.mxu1 %vm5893_vm1, %v5894_v21  ;;  %v4442_v40 = vld [vmem:[#allocation8] ss:$0 sm:$0xff]  ;;  %v4443_v41 = vld [vmem:[#allocation10] ss:$0 sm:$0xff] }
  0x85   :  { %v6077_v16 = vsub.f32 %v157_v6, %v172_v8  ;;  %v6083_v19 = vsub.f32 %v159_v12, %v178_v14  ;;  %vm161_vm2 = vcmask 261120   ;;  %vm2960_vm5 = vcmask 64512  }
  0x86   :  { %v6065_v10 = vpack.c.bf16 %v175_v9, %v172_v8  ;;  %v6079_v17 = vsub.f32 %v158_v7, %v175_v9  ;;  %v6081_v18 = vpack.c.bf16 %v181_v15, %v178_v14  ;;  %v6085_v20 = vsub.f32 %v160_v13, %v181_v15 }
  0x87   :  { %132 = vadd.xlane.f32.xlu0 %v131_v5  ;;  %v273_v22 = vand.u32 4294901760, %v6077_v16  ;;  %v287_v28 = vand.u32 4294901760, %v6083_v19  ;;  %v750_v8 = vsel %vm127_vm0, %v6047_v0, 0  ;;  %v756_v14 = vsel %vm127_vm0, %v6049_v1, 0 }
  0x88   :  { %5317 = vmatpush3.bf16.msra.mxu0 %v6065_v10  ;;  %v280_v23 = vand.u32 4294901760, %v6079_v17  ;;  %v294_v29 = vand.u32 4294901760, %v6085_v20  ;;  %v5328_v36 = vpack.c.bf16 %v6079_v17, %v6077_v16  ;;  %v5331_v37 = vpack.c.bf16 %v6085_v20, %v6083_v19 }
  0x89   :  { %5318 = vmatprep.subr.bf16.mxu0 %v5892_v11  ;;  %v274_v24 = vsub.f32 %v6077_v16, %v273_v22  ;;  %v288_v31 = vsub.f32 %v6083_v19, %v287_v28  ;;  %v6184_v9 = vand.u32 4294901760, %v750_v8  ;;  %vm4409_vm6 = vcmask 123904  }
  0x8a   :  { %v281_v25 = vsub.f32 %v6079_v17, %v280_v23  ;;  %v295_v32 = vsub.f32 %v6085_v20, %v294_v29  ;;  %v6105_v38 = vpack.c.bf16 %v280_v23, %v273_v22  ;;  %v6107_v39 = vpack.c.bf16 %v294_v29, %v287_v28 }
  0x8b   :  { %v275_v26 = vand.u32 4294901760, %v274_v24  ;;  %v289_v33 = vand.u32 4294901760, %v288_v31  ;;  %v6189_v12 = vsub.f32 %v750_v8, %v6184_v9 }
  0x8c   :  { %5320 = vmatpush3.bf16.msra.mxu0 %v6081_v18  ;;  %v282_v27 = vand.u32 4294901760, %v281_v25  ;;  %v296_v34 = vand.u32 4294901760, %v295_v32 }
  0x8d   :  { %5321 = vmatprep.subr.bf16.mxu0 %v5892_v11  ;;  %v6201_v19 = vand.u32 4294901760, %v6189_v12 }
  0x8e   :  { %v5322_v30 = vpack.c.bf16 %v282_v27, %v275_v26  ;;  %v5325_v35 = vpack.c.bf16 %v296_v34, %v289_v33 }
  0x8f   :  { %v829_v1 = vsub.f32 %v6189_v12, %v6201_v19 }
 0x110   :  { %v130_v42 = vpop.xlane.xlu0 %129  ;;  %v136_v43 = vpop.xlane.xlu1 %135 }
 0x111   :  { %v144_v44 = vmul.f32 %v4442_v40, %v130_v42  ;;  %v146_v45 = vmul.f32 %v4442_v40, %v136_v43 }
 0x113   :  { %v154_v46 = vadd.f32 %v4443_v41, %v144_v44  ;;  %v156_v47 = vadd.f32 %v4443_v41, %v146_v45 }
 0x114   :  { %v133_v48 = vpop.xlane.xlu0 %132 }
 0x115   :  { %v163_v49 = vsel %vm161_vm2, %v154_v46, 0  ;;  %v169_v50 = vsel %vm161_vm2, %v156_v47, 0  ;;  %v145_v51 = vmul.f32 %v4442_v40, %v133_v48 }
 0x116   :  { %v6111_v52 = vand.u32 4294901760, %v163_v49  ;;  %v6113_v53 = vand.u32 4294901760, %v169_v50 }
 0x117   :  { %v155_v54 = vadd.f32 %v4443_v41, %v145_v51  ;;  %v4446_v51 = vld [vmem:[%s6622_s5 + $0x28] sm:$0xff] }
 0x118   :  { %v241_v55 = vsub.f32 %v163_v49, %v6111_v52  ;;  %v261_v57 = vsub.f32 %v169_v50, %v6113_v53  ;;  %v4445_v50 = vld [vmem:[%s6622_s5 + $0x20] sm:$0xff] }
 0x119   :  { %v166_v56 = vsel %vm161_vm2, %v155_v54, 0 }
 0x11a   :  { %v6118_v58 = vand.u32 4294901760, %v166_v56  ;;  %v242_v59 = vand.u32 4294901760, %v241_v55  ;;  %v262_v3 = vand.u32 4294901760, %v261_v57 }
 0x11c   :  { %v251_v60 = vsub.f32 %v166_v56, %v6118_v58  ;;  %v243_v61 = vsub.f32 %v241_v55, %v242_v59  ;;  %v263_v6 = vsub.f32 %v261_v57, %v262_v3  ;;  %v4448_v56 = vld [vmem:[%s6622_s5 + $0x38] sm:$0xff] }
 0x11e   :  { %v244_v62 = vand.u32 4294901760, %v243_v61  ;;  %v252_v63 = vand.u32 4294901760, %v251_v60  ;;  %v264_v7 = vand.u32 4294901760, %v263_v6 }
 0x120   :  { %4724 = vmatmul.mubr.f32.vlgmr.msra.gmra.mrb[0].mxu0 %v244_v62  ;;  %v253_v4 = vsub.f32 %v251_v60, %v252_v63 }
 0x121   :  { %4726 = vmatprep.mubr.msk.f32.mxu0 %vm5893_vm1, %v5894_v21  ;;  %5323 = vmatpush3.bf16.msra.mxu0 %v5322_v30 }
 0x122   :  { %v254_v5 = vand.u32 4294901760, %v253_v4  ;;  %5324 = vmatprep.subr.bf16.mxu0 %v5892_v11 }
 0x124   :  { %4727 = vmatmul.mubr.f32.gmra.mrb[2].mxu0 %v254_v5 }
 0x125   :  { %4729 = vmatprep.mubr.msk.f32.mxu0 %vm5893_vm1, %v5894_v21  ;;  %5326 = vmatpush3.bf16.msra.mxu0 %v5325_v35  ;;  %v6217_v35 = vand.u32 4294901760, %v829_v1 }
 0x126   :  { %5327 = vmatprep.subr.bf16.mxu0 %v5892_v11 }
 0x128   :  { %4730 = vmatmul.mubr.f32.gmra.mrb[4].mxu0 %v264_v7 }
 0x129   :  { %4740 = vmatprep.mubr.msk.f32.mxu0 %vm5893_vm1, %v5894_v21 }
 0x12c   :  { %4741 = vmatmul.mubr.f32.vlgmr.msra.gmra.mrb[0].mxu0 %v6111_v52 }
 0x12d   :  { %4743 = vmatprep.mubr.msk.f32.mxu0 %vm5893_vm1, %v5894_v21  ;;  %5329 = vmatpush3.bf16.msra.mxu0 %v5328_v36 }
 0x12e   :  { %5330 = vmatprep.subr.bf16.mxu0 %v5892_v11 }
 0x130   :  { %4744 = vmatmul.mubr.f32.gmra.mrb[2].mxu0 %v6118_v58 }
 0x131   :  { %4746 = vmatprep.mubr.msk.f32.mxu0 %vm5893_vm1, %v5894_v21  ;;  %5332 = vmatpush3.bf16.msra.mxu0 %v5331_v37 }
 0x132   :  { %5333 = vmatprep.subr.bf16.mxu0 %v5892_v11 }
 0x134   :  { %4747 = vmatmul.mubr.f32.gmra.mrb[4].mxu0 %v6113_v53 }
 0x135   :  { %4757 = vmatprep.mubr.msk.f32.mxu0 %vm5893_vm1, %v5894_v21 }
 0x138   :  { %4758 = vmatmul.mubr.f32.vlgmr.msra.gmra.mrb[0].mxu0 %v241_v55  ;;  %v4447_v55 = vld [vmem:[%s6622_s5 + $0x30] sm:$0xff] }
 0x139   :  { %4760 = vmatprep.mubr.msk.f32.mxu0 %vm5893_vm1, %v5894_v21  ;;  %5335 = vmatpush3.bf16.msra.mxu0 %v6065_v10 }
 0x13a   :  { %5336 = vmatprep.subr.bf16.mxu0 %v5892_v11 }
 0x13c   :  { %4761 = vmatmul.mubr.f32.gmra.mrb[2].mxu0 %v251_v60 }
 0x13d   :  { %4763 = vmatprep.mubr.msk.f32.mxu0 %vm5893_vm1, %v5894_v21  ;;  %5338 = vmatpush3.bf16.msra.mxu0 %v6081_v18 }
 0x13e   :  { %5339 = vmatprep.subr.bf16.mxu0 %v5892_v11 }
 0x140   :  { %4764 = vmatmul.mubr.f32.gmra.mrb[4].mxu0 %v261_v57  ;;  %v1337_v57 = vand.u32 4294901760, %v4447_v55 }
 0x141   :  { %4774 = vmatprep.mubr.msk.f32.mxu0 %vm5893_vm1, %v5894_v21 }
 0x144   :  { %4775 = vmatmul.mubr.f32.vlgmr.msra.gmra.mrb[0].mxu0 %v242_v59 }
 0x145   :  { %4777 = vmatprep.mubr.msk.f32.mxu0 %vm5893_vm1, %v5894_v21  ;;  %5341 = vmatpush3.bf16.msra.mxu0 %v6105_v38 }
 0x146   :  { %5342 = vmatprep.subr.bf16.mxu0 %v5892_v11 }
 0x148   :  { %4778 = vmatmul.mubr.f32.gmra.mrb[2].mxu0 %v252_v63 }
 0x149   :  { %4780 = vmatprep.mubr.msk.f32.mxu0 %vm5893_vm1, %v5894_v21  ;;  %5344 = vmatpush3.bf16.msra.mxu0 %v6107_v39 }
 0x14a   :  { %5345 = vmatprep.subr.bf16.mxu0 %v5892_v11 }
 0x14c   :  { %4781 = vmatmul.mubr.f32.gmra.mrb[4].mxu0 %v262_v3  ;;  %v1445_v3 = vsub.f32 %v4447_v55, %v1337_v57 }
 0x14d   :  { %4791 = vmatprep.mubr.msk.f32.mxu0 %vm5893_vm1, %v5894_v21 }
 0x150   :  { %4792 = vmatmul.mubr.f32.vlgmr.msra.gmra.mrb[0].mxu0 %v6111_v52 }
 0x151   :  { %4794 = vmatprep.mubr.msk.f32.mxu0 %vm5893_vm1, %v5894_v21  ;;  %5347 = vmatpush3.bf16.msra.mxu0 %v6065_v10  ;;  %v753_v10 = vsel %vm127_vm0, %v6051_v2, 0 }
 0x152   :  { %5348 = vmatprep.subr.bf16.mxu0 %v5892_v11  ;;  %v6191_v13 = vand.u32 4294901760, %v753_v10 }
 0x154   :  { %4795 = vmatmul.mubr.f32.gmra.mrb[2].mxu0 %v6118_v58  ;;  %v6198_v0 = vsub.f32 %v753_v10, %v6191_v13  ;;  %v1446_v10 = vand.u32 4294901760, %v1445_v3 }
 0x155   :  { %4797 = vmatprep.mubr.msk.f32.mxu0 %vm5893_vm1, %v5894_v21  ;;  %5350 = vmatpush3.bf16.msra.mxu0 %v6081_v18  ;;  %v6195_v18 = vand.u32 4294901760, %v756_v14 }
 0x156   :  { %5405 = vmatprep.subr.bf16.mxu0 %v5892_v11  ;;  %v6209_v26 = vand.u32 4294901760, %v6198_v0 }
 0x157   :  { %v6204_v25 = vsub.f32 %v756_v14, %v6195_v18 }
 0x158   :  { %4798 = vmatmul.mubr.f32.gmra.mrb[4].mxu0 %v6113_v53  ;;  %v839_v36 = vsub.f32 %v6198_v0, %v6209_v26 }
 0x159   :  { %4808 = vmatprep.mubr.msk.f32.mxu0 %vm5893_vm1, %v5894_v21  ;;  %v6222_v37 = vand.u32 4294901760, %v6204_v25 }
 0x15a   :  { %v6228_v44 = vand.u32 4294901760, %v839_v36 }
 0x15b   :  { %v849_v45 = vsub.f32 %v6204_v25, %v6222_v37 }
 0x15c   :  { %4809 = vmatmul.mubr.f32.vlgmr.msra.gmra.mrb[0].mxu0 %v6111_v52  ;;  %v1331_v52 = vand.u32 4294901760, %v4445_v50 }
 0x15d   :  { %4811 = vmatprep.mubr.msk.f32.mxu0 %vm5893_vm1, %v5894_v21  ;;  %v6236_v48 = vand.u32 4294901760, %v849_v45 }
 0x15e   :  { %v6317_v59 = vsub.f32 %v4445_v50, %v1331_v52 }
 0x160   :  { %4812 = vmatmul.mubr.f32.gmra.mrb[2].mxu0 %v6118_v58  ;;  %v1340_v58 = vand.u32 4294901760, %v4448_v56  ;;  %v1432_v62 = vand.u32 4294901760, %v6317_v59 }
 0x161   :  { %4814 = vmatprep.mubr.msk.f32.mxu0 %vm5893_vm1, %v5894_v21 }
 0x162   :  { %v6321_v61 = vpack.c.bf16 %v1340_v58, %v1337_v57  ;;  %v1452_v4 = vsub.f32 %v4448_v56, %v1340_v58  ;;  %v1433_v5 = vsub.f32 %v6317_v59, %v1432_v62 }
 0x164   :  { %4815 = vmatmul.mubr.f32.gmra.mrb[4].mxu0 %v6113_v53  ;;  %v1334_v53 = vand.u32 4294901760, %v4446_v51  ;;  %v1434_v7 = vand.u32 4294901760, %v1433_v5  ;;  %v1453_v14 = vand.u32 4294901760, %v1452_v4 }
 0x165   :  { %5015 = vmatprep.mubr.msk.f32.mxu0 %vm5893_vm1, %v5894_v21 }
 0x166   :  { %v6307_v54 = vpack.c.bf16 %v1334_v53, %v1331_v52  ;;  %v6319_v60 = vsub.f32 %v4446_v51, %v1334_v53 }
 0x168   :  { %v1439_v63 = vand.u32 4294901760, %v6319_v60 }
 0x16a   :  { %v1440_v6 = vsub.f32 %v6319_v60, %v1439_v63  ;;  %v5394_v1 = vpack.c.bf16 %v1439_v63, %v1432_v62 }
 0x16c   :  { %v1441_v8 = vand.u32 4294901760, %v1440_v6 }
 0x22f   :  { %v726_v15 = vpop.f32.mrb[0].mxu0 }
 0x230   :  { %v759_v16 = vand.u32 4294901760, %v726_v15  ;;  %v4810_v17 = vpop.f32.mrb[1].mxu0 }
 0x231   :  { %v1454_v17 = vsub.f32 %v1452_v4, %v1453_v14 }
 0x232   :  { %v858_v2 = vsub.f32 %v726_v15, %v759_v16  ;;  %v5376_v15 = vpack.c.bf16 %v1441_v8, %v1434_v7 }
 0x233   :  { %v732_v20 = vpop.f32.mrb[2].mxu0 }
 0x234   :  { %v859_v22 = vand.u32 4294901760, %v858_v2  ;;  %v762_v23 = vand.u32 4294901760, %v732_v20  ;;  %v4813_v24 = vpop.f32.mrb[3].mxu0 }
 0x235   :  { %v5385_v24 = vpack.c.bf16 %v1452_v4, %v1445_v3 }
 0x236   :  { %v6211_v27 = vpack.c.bf16 %v762_v23, %v759_v16  ;;  %v865_v28 = vsub.f32 %v732_v20, %v762_v23  ;;  %v860_v30 = vsub.f32 %v858_v2, %v859_v22  ;;  %v1447_v16 = vsub.f32 %v1445_v3, %v1446_v10 }
 0x237   :  { %v738_v29 = vpop.f32.mrb[4].mxu0  ;;  %v1455_v20 = vand.u32 4294901760, %v1454_v17  ;;  %v5382_v23 = vpack.c.bf16 %v6319_v60, %v6317_v59 }
 0x238   :  { %v866_v31 = vand.u32 4294901760, %v865_v28  ;;  %v5358_v32 = vpack.c.bf16 %v865_v28, %v858_v2  ;;  %v6213_v33 = vand.u32 4294901760, %v738_v29  ;;  %v4816_v34 = vpop.f32.mrb[5].mxu0  ;;  %5353 = vmatpush3.bf16.msra.mxu1 %v6211_v27  ;;  %v861_v41 = vand.u32 4294901760, %v860_v30 }
 0x239   :  { %4821 = vmatprep.subr.mxu1 %v5894_v21  ;;  %v1448_v2 = vand.u32 4294901760, %v1447_v16 }
 0x23a   :  { %v867_v38 = vsub.f32 %v865_v28, %v866_v31  ;;  %v872_v39 = vsub.f32 %v738_v29, %v6213_v33  ;;  %v5364_v40 = vpack.c.bf16 %v866_v31, %v859_v22  ;;  %v4444_v28 = vld [vmem:[%s6623_s6] ss:$0 sm:$0xff] }
 0x23b   :  { %v5379_v22 = vpack.c.bf16 %v1455_v20, %v1448_v2 }
 0x23c   :  { %v868_v42 = vand.u32 4294901760, %v867_v38  ;;  %v873_v43 = vand.u32 4294901760, %v872_v39  ;;  %4822 = vmatpush3.msra.mxu1 %v6213_v33 }
 0x23d   :  { %4824 = vmatmul.mubr.f32.vlgmr.msra.gmra.mrb[0].mxu1 %v6217_v35  ;;  %5354 = vmatprep.subr.bf16.mxu1 %v5892_v11 }
 0x23e   :  { %v874_v46 = vsub.f32 %v872_v39, %v873_v43  ;;  %4826 = vmatprep.mubr.msk.f32.mxu1 %vm5893_vm1, %v5894_v21  ;;  %v5355_v47 = vpack.c.bf16 %v868_v42, %v861_v41 }
 0x240   :  { %5356 = vmatpush3.bf16.msra.mxu1 %v5355_v47  ;;  %v875_v49 = vand.u32 4294901760, %v874_v46 }
 0x241   :  { %4827 = vmatmul.mubr.f32.gmra.mrb[2].mxu1 %v6228_v44  ;;  %4836 = vmatprep.subr.mxu1 %v5894_v21 }
 0x242   :  { %4829 = vmatprep.mubr.msk.f32.mxu1 %vm5893_vm1, %v5894_v21 }
 0x244   :  { %4837 = vmatpush3.msra.mxu1 %v875_v49 }
 0x245   :  { %4830 = vmatmul.mubr.f32.gmra.mrb[4].mxu1 %v6236_v48  ;;  %5357 = vmatprep.subr.bf16.mxu1 %v5892_v11 }
 0x246   :  { %4838 = vmatprep.mubr.msk.f32.mxu1 %vm5893_vm1, %v5894_v21 }
 0x249   :  { %4839 = vmatmul.mubr.f32.vlgmr.msra.gmra.mrb[0].mxu1 %v6184_v9 }
 0x24a   :  { %5359 = vmatpush3.bf16.msra.mxu1 %v5358_v32  ;;  %4841 = vmatprep.mubr.msk.f32.mxu1 %vm5893_vm1, %v5894_v21 }
 0x24b   :  { %4851 = vmatprep.subr.mxu1 %v5894_v21 }
 0x24d   :  { %4842 = vmatmul.mubr.f32.gmra.mrb[2].mxu1 %v6191_v13 }
 0x24e   :  { %4852 = vmatpush3.msra.mxu1 %v872_v39  ;;  %4844 = vmatprep.mubr.msk.f32.mxu1 %vm5893_vm1, %v5894_v21 }
 0x24f   :  { %5360 = vmatprep.subr.bf16.mxu1 %v5892_v11 }
 0x251   :  { %4845 = vmatmul.mubr.f32.gmra.mrb[4].mxu1 %v6195_v18 }
 0x252   :  { %4853 = vmatprep.mubr.msk.f32.mxu1 %vm5893_vm1, %v5894_v21 }
 0x255   :  { %4854 = vmatmul.mubr.f32.vlgmr.msra.gmra.mrb[0].mxu1 %v6189_v12 }
 0x256   :  { %5362 = vmatpush3.bf16.msra.mxu1 %v6211_v27  ;;  %4856 = vmatprep.mubr.msk.f32.mxu1 %vm5893_vm1, %v5894_v21 }
 0x257   :  { %4866 = vmatprep.subr.mxu1 %v5894_v21 }
 0x259   :  { %4857 = vmatmul.mubr.f32.gmra.mrb[2].mxu1 %v6198_v0 }
 0x25a   :  { %4867 = vmatpush3.msra.mxu1 %v6213_v33  ;;  %4859 = vmatprep.mubr.msk.f32.mxu1 %vm5893_vm1, %v5894_v21 }
 0x25b   :  { %5363 = vmatprep.subr.bf16.mxu1 %v5892_v11 }
 0x25d   :  { %4860 = vmatmul.mubr.f32.gmra.mrb[4].mxu1 %v6204_v25 }
 0x25e   :  { %4868 = vmatprep.mubr.msk.f32.mxu1 %vm5893_vm1, %v5894_v21 }
 0x261   :  { %4869 = vmatmul.mubr.f32.vlgmr.msra.gmra.mrb[0].mxu1 %v6201_v19 }
 0x262   :  { %5365 = vmatpush3.bf16.msra.mxu1 %v5364_v40  ;;  %4871 = vmatprep.mubr.msk.f32.mxu1 %vm5893_vm1, %v5894_v21 }
 0x263   :  { %4881 = vmatprep.subr.mxu1 %v5894_v21 }
 0x265   :  { %4872 = vmatmul.mubr.f32.gmra.mrb[2].mxu1 %v6209_v26 }
 0x266   :  { %4882 = vmatpush3.msra.mxu1 %v873_v43  ;;  %4874 = vmatprep.mubr.msk.f32.mxu1 %vm5893_vm1, %v5894_v21 }
 0x267   :  { %5366 = vmatprep.subr.bf16.mxu1 %v5892_v11 }
 0x269   :  { %4875 = vmatmul.mubr.f32.gmra.mrb[4].mxu1 %v6222_v37 }
 0x26a   :  { %4883 = vmatprep.mubr.msk.f32.mxu1 %vm5893_vm1, %v5894_v21 }
 0x26d   :  { %4884 = vmatmul.mubr.f32.vlgmr.msra.gmra.mrb[0].mxu1 %v6184_v9 }
 0x26e   :  { %5368 = vmatpush3.bf16.msra.mxu1 %v6211_v27  ;;  %4886 = vmatprep.mubr.msk.f32.mxu1 %vm5893_vm1, %v5894_v21  ;;  %v6331_v27 = vpack.c.bf16 %v1453_v14, %v1446_v10 }
 0x26f   :  { %4896 = vmatprep.subr.mxu1 %v5894_v21 }
 0x271   :  { %4887 = vmatmul.mubr.f32.gmra.mrb[2].mxu1 %v6191_v13 }
 0x272   :  { %4897 = vmatpush3.msra.mxu1 %v6213_v33  ;;  %4889 = vmatprep.mubr.msk.f32.mxu1 %vm5893_vm1, %v5894_v21 }
 0x273   :  { %5369 = vmatprep.subr.bf16.mxu1 %v5892_v11 }
 0x275   :  { %4890 = vmatmul.mubr.f32.gmra.mrb[4].mxu1 %v6195_v18 }
 0x276   :  { %4898 = vmatprep.mubr.msk.f32.mxu1 %vm5893_vm1, %v5894_v21 }
 0x279   :  { %4899 = vmatmul.mubr.f32.vlgmr.msra.gmra.mrb[0].mxu1 %v6184_v9 }
 0x27a   :  { %4901 = vmatprep.mubr.msk.f32.mxu1 %vm5893_vm1, %v5894_v21  ;;  %5371 = vmatpush3.bf16.msra.mxu1 %v6307_v54 }
 0x27b   :  { %5372 = vmatprep.subr.bf16.mxu1 %v5892_v11 }
 0x27d   :  { %4902 = vmatmul.mubr.f32.gmra.mrb[2].mxu1 %v6191_v13 }
 0x27e   :  { %4904 = vmatprep.mubr.msk.f32.mxu1 %vm5893_vm1, %v5894_v21  ;;  %5374 = vmatpush3.bf16.msra.mxu1 %v6321_v61 }
 0x27f   :  { %5375 = vmatprep.subr.bf16.mxu1 %v5892_v11 }
 0x281   :  { %4905 = vmatmul.mubr.f32.gmra.mrb[4].mxu1 %v6195_v18 }
 0x282   :  { %4915 = vmatprep.mubr.msk.f32.mxu1 %vm5893_vm1, %v5894_v21 }
 0x34c   :  { %v1300_v29 = vpop.f32.mrb[0].mxu1 }
 0x34d   :  { %v5513_v30 = vadd.f32 %v4444_v28, %v1300_v29  ;;  %v4900_v31 = vpop.f32.mrb[1].mxu1 }
 0x34f   :  { %v1322_v32 = vsel %vm161_vm2, %v5513_v30, 0 }
 0x350   :  { %v6337_v33 = vand.u32 4294901760, %v1322_v32  ;;  %v1306_v34 = vpop.f32.mrb[2].mxu1 }
 0x351   :  { %v5514_v36 = vadd.f32 %v4444_v28, %v1306_v34  ;;  %v4903_v38 = vpop.f32.mrb[3].mxu1 }
 0x352   :  { %v1400_v39 = vsub.f32 %v1322_v32, %v6337_v33 }
 0x353   :  { %v1325_v40 = vsel %vm161_vm2, %v5514_v36, 0 }
 0x354   :  { %v1401_v41 = vand.u32 4294901760, %v1400_v39  ;;  %v6341_v42 = vand.u32 4294901760, %v1325_v40  ;;  %v1312_v43 = vpop.f32.mrb[4].mxu1 }
 0x355   :  { %v5515_v45 = vadd.f32 %v4444_v28, %v1312_v43  ;;  %v4906_v46 = vpop.f32.mrb[5].mxu1 }
 0x356   :  { %v1402_v47 = vsub.f32 %v1400_v39, %v1401_v41  ;;  %v1410_v49 = vsub.f32 %v1325_v40, %v6341_v42 }
 0x357   :  { %v1328_v50 = vsel %vm161_vm2, %v5515_v45, 0 }
 0x358   :  { %v1403_v51 = vand.u32 4294901760, %v1402_v47  ;;  %v1419_v52 = vand.u32 4294901760, %v1328_v50  ;;  %v1411_v53 = vand.u32 4294901760, %v1410_v49 }
 0x35a   :  { %v1420_v55 = vsub.f32 %v1328_v50, %v1419_v52  ;;  %4916 = vmatmul.mubr.f32.vlgmr.msra.gmra.mrb[6].mxu1 %v1403_v51  ;;  %v1412_v56 = vsub.f32 %v1410_v49, %v1411_v53 }
 0x35b   :  { %4918 = vmatprep.mubr.msk.f32.mxu1 %vm5893_vm1, %v5894_v21  ;;  %5377 = vmatpush3.bf16.msra.mxu1 %v5376_v15 }
 0x35c   :  { %v1413_v57 = vand.u32 4294901760, %v1412_v56  ;;  %v1421_v58 = vand.u32 4294901760, %v1420_v55  ;;  %5378 = vmatprep.subr.bf16.mxu1 %v5892_v11 }
 0x35e   :  { %4919 = vmatmul.mubr.f32.gmra.mrb[8].mxu1 %v1413_v57  ;;  %v1422_v59 = vsub.f32 %v1420_v55, %v1421_v58 }
 0x35f   :  { %4921 = vmatprep.mubr.msk.f32.mxu1 %vm5893_vm1, %v5894_v21  ;;  %5380 = vmatpush3.bf16.msra.mxu1 %v5379_v22 }
 0x360   :  { %v1423_v60 = vand.u32 4294901760, %v1422_v59  ;;  %5381 = vmatprep.subr.bf16.mxu1 %v5892_v11 }
 0x362   :  { %4922 = vmatmul.mubr.f32.gmra.mrb[10].mxu1 %v1423_v60 }
 0x363   :  { %4932 = vmatprep.mubr.msk.f32.mxu1 %vm5893_vm1, %v5894_v21 }
 0x366   :  { %4933 = vmatmul.mubr.f32.vlgmr.msra.gmra.mrb[6].mxu1 %v6337_v33 }
 0x367   :  { %4935 = vmatprep.mubr.msk.f32.mxu1 %vm5893_vm1, %v5894_v21  ;;  %5383 = vmatpush3.bf16.msra.mxu1 %v5382_v23 }
 0x368   :  { %5384 = vmatprep.subr.bf16.mxu1 %v5892_v11 }
 0x36a   :  { %4936 = vmatmul.mubr.f32.gmra.mrb[8].mxu1 %v6341_v42 }
 0x36b   :  { %4938 = vmatprep.mubr.msk.f32.mxu1 %vm5893_vm1, %v5894_v21  ;;  %5386 = vmatpush3.bf16.msra.mxu1 %v5385_v24 }
 0x36c   :  { %5387 = vmatprep.subr.bf16.mxu1 %v5892_v11 }
 0x36e   :  { %4939 = vmatmul.mubr.f32.gmra.mrb[10].mxu1 %v1419_v52 }
 0x36f   :  { %4949 = vmatprep.mubr.msk.f32.mxu1 %vm5893_vm1, %v5894_v21 }
 0x372   :  { %4950 = vmatmul.mubr.f32.vlgmr.msra.gmra.mrb[6].mxu1 %v1400_v39 }
 0x373   :  { %4952 = vmatprep.mubr.msk.f32.mxu1 %vm5893_vm1, %v5894_v21  ;;  %5389 = vmatpush3.bf16.msra.mxu1 %v6307_v54 }
 0x374   :  { %5390 = vmatprep.subr.bf16.mxu1 %v5892_v11 }
 0x376   :  { %4953 = vmatmul.mubr.f32.gmra.mrb[8].mxu1 %v1410_v49 }
 0x377   :  { %4955 = vmatprep.mubr.msk.f32.mxu1 %vm5893_vm1, %v5894_v21  ;;  %5392 = vmatpush3.bf16.msra.mxu1 %v6321_v61 }
 0x378   :  { %5393 = vmatprep.subr.bf16.mxu1 %v5892_v11 }
 0x37a   :  { %4956 = vmatmul.mubr.f32.gmra.mrb[10].mxu1 %v1420_v55 }
 0x37b   :  { %4966 = vmatprep.mubr.msk.f32.mxu1 %vm5893_vm1, %v5894_v21 }
 0x37e   :  { %4967 = vmatmul.mubr.f32.vlgmr.msra.gmra.mrb[6].mxu1 %v1401_v41 }
 0x37f   :  { %4969 = vmatprep.mubr.msk.f32.mxu1 %vm5893_vm1, %v5894_v21  ;;  %5395 = vmatpush3.bf16.msra.mxu1 %v5394_v1 }
 0x380   :  { %5396 = vmatprep.subr.bf16.mxu1 %v5892_v11 }
 0x382   :  { %4970 = vmatmul.mubr.f32.gmra.mrb[8].mxu1 %v1411_v53 }
 0x383   :  { %4972 = vmatprep.mubr.msk.f32.mxu1 %vm5893_vm1, %v5894_v21  ;;  %5398 = vmatpush3.bf16.msra.mxu1 %v6331_v27 }
 0x384   :  { %5399 = vmatprep.subr.bf16.mxu1 %v5892_v11 }
 0x386   :  { %4973 = vmatmul.mubr.f32.gmra.mrb[10].mxu1 %v1421_v58 }
 0x387   :  { %4983 = vmatprep.mubr.msk.f32.mxu1 %vm5893_vm1, %v5894_v21 }
 0x38a   :  { %4984 = vmatmul.mubr.f32.vlgmr.msra.gmra.mrb[6].mxu1 %v6337_v33 }
 0x38b   :  { %4986 = vmatprep.mubr.msk.f32.mxu1 %vm5893_vm1, %v5894_v21  ;;  %5401 = vmatpush3.bf16.msra.mxu1 %v6307_v54 }
 0x38c   :  { %5402 = vmatprep.subr.bf16.mxu1 %v5892_v11 }
 0x38e   :  { %4987 = vmatmul.mubr.f32.gmra.mrb[8].mxu1 %v6341_v42 }
 0x38f   :  { %4989 = vmatprep.mubr.msk.f32.mxu1 %vm5893_vm1, %v5894_v21  ;;  %5404 = vmatpush3.bf16.msra.mxu1 %v6321_v61 }
 0x390   :  { %5426 = vmatprep.subr.bf16.mxu1 %v5892_v11 }
 0x392   :  { %4990 = vmatmul.mubr.f32.gmra.mrb[10].mxu1 %v1419_v52 }
 0x393   :  { %5000 = vmatprep.mubr.msk.f32.mxu1 %vm5893_vm1, %v5894_v21 }
 0x396   :  { %5001 = vmatmul.mubr.f32.vlgmr.msra.gmra.mrb[6].mxu1 %v6337_v33 }
 0x397   :  { %5003 = vmatprep.mubr.msk.f32.mxu1 %vm5893_vm1, %v5894_v21 }
 0x39a   :  { %5004 = vmatmul.mubr.f32.gmra.mrb[8].mxu1 %v6341_v42 }
 0x39b   :  { %5006 = vmatprep.mubr.msk.f32.mxu1 %vm5893_vm1, %v5894_v21 }
 0x39e   :  { %5007 = vmatmul.mubr.f32.gmra.mrb[10].mxu1 %v1419_v52 }
 0x39f   :  { %5114 = vmatprep.mubr.msk.f32.mxu1 %vm5893_vm1, %v5894_v21 }
 0x469   :  { %v1885_v54 = vpop.f32.mrb[6].mxu1 }
 0x46a   :  { %v1910_v61 = vand.u32 4294901760, %v1885_v54  ;;  %v5002_v62 = vpop.f32.mrb[7].mxu1 }
 0x46c   :  { %v2009_v63 = vsub.f32 %v1885_v54, %v1910_v61 }
 0x46d   :  { %v1891_v3 = vpop.f32.mrb[8].mxu1 }
 0x46e   :  { %v2010_v4 = vand.u32 4294901760, %v2009_v63  ;;  %v1913_v5 = vand.u32 4294901760, %v1891_v3  ;;  %v5005_v6 = vpop.f32.mrb[9].mxu1 }
 0x470   :  { %v5406_v7 = vpack.c.bf16 %v1913_v5, %v1910_v61  ;;  %v2016_v8 = vsub.f32 %v1891_v3, %v1913_v5  ;;  %v2011_v14 = vsub.f32 %v2009_v63, %v2010_v4 }
 0x471   :  { %v1897_v10 = vpop.f32.mrb[10].mxu1 }
 0x472   :  { %v2017_v15 = vand.u32 4294901760, %v2016_v8  ;;  %v5412_v16 = vpack.c.bf16 %v2016_v8, %v2009_v63  ;;  %v1916_v17 = vand.u32 4294901760, %v1897_v10  ;;  %v5008_v2 = vpop.f32.mrb[11].mxu1  ;;  %5407 = vmatpush3.bf16.msra.mxu0 %v5406_v7  ;;  %v2012_v24 = vand.u32 4294901760, %v2011_v14  ;;  %v4456_v63 = vld [vmem:[#allocation7] ss:$0 sm:$0xff] }
 0x473   :  { %5013 = vmatprep.subr.mxu0 %v5894_v21 }
 0x474   :  { %v2018_v20 = vsub.f32 %v2016_v8, %v2017_v15  ;;  %v2023_v22 = vsub.f32 %v1897_v10, %v1916_v17  ;;  %v5418_v23 = vpack.c.bf16 %v2017_v15, %v2010_v4 }
 0x476   :  { %v2019_v1 = vand.u32 4294901760, %v2018_v20  ;;  %v2024_v27 = vand.u32 4294901760, %v2023_v22  ;;  %5014 = vmatpush3.msra.mxu0 %v1916_v17 }
 0x477   :  { %5016 = vmatmul.mubr.f32.vlgmr.msra.gmra.mrb[6].mxu0 %v6217_v35  ;;  %5408 = vmatprep.subr.bf16.mxu0 %v5892_v11 }
 0x478   :  { %v2025_v28 = vsub.f32 %v2023_v22, %v2024_v27  ;;  %5018 = vmatprep.mubr.msk.f32.mxu0 %vm5893_vm1, %v5894_v21  ;;  %v5409_v29 = vpack.c.bf16 %v2019_v1, %v2012_v24  ;;  %v3411_v24 = vld [vmem:[#allocation11 + $0x8] sm:$0xff] }
 0x47a   :  { %5410 = vmatpush3.bf16.msra.mxu0 %v5409_v29  ;;  %v2026_v30 = vand.u32 4294901760, %v2025_v28 }
 0x47b   :  { %5019 = vmatmul.mubr.f32.gmra.mrb[8].mxu0 %v6228_v44  ;;  %5028 = vmatprep.subr.mxu0 %v5894_v21 }
 0x47c   :  { %5021 = vmatprep.mubr.msk.f32.mxu0 %vm5893_vm1, %v5894_v21 }
 0x47e   :  { %5029 = vmatpush3.msra.mxu0 %v2026_v30 }
 0x47f   :  { %5022 = vmatmul.mubr.f32.gmra.mrb[10].mxu0 %v6236_v48  ;;  %5411 = vmatprep.subr.bf16.mxu0 %v5892_v11 }
 0x480   :  { %5030 = vmatprep.mubr.msk.f32.mxu0 %vm5893_vm1, %v5894_v21 }
 0x483   :  { %5031 = vmatmul.mubr.f32.vlgmr.msra.gmra.mrb[6].mxu0 %v6184_v9 }
 0x484   :  { %5413 = vmatpush3.bf16.msra.mxu0 %v5412_v16  ;;  %5033 = vmatprep.mubr.msk.f32.mxu0 %vm5893_vm1, %v5894_v21 }
 0x485   :  { %5043 = vmatprep.subr.mxu0 %v5894_v21 }
 0x487   :  { %5034 = vmatmul.mubr.f32.gmra.mrb[8].mxu0 %v6191_v13 }
 0x488   :  { %5044 = vmatpush3.msra.mxu0 %v2023_v22  ;;  %5036 = vmatprep.mubr.msk.f32.mxu0 %vm5893_vm1, %v5894_v21 }
 0x489   :  { %5414 = vmatprep.subr.bf16.mxu0 %v5892_v11 }
 0x48b   :  { %5037 = vmatmul.mubr.f32.gmra.mrb[10].mxu0 %v6195_v18 }
 0x48c   :  { %5045 = vmatprep.mubr.msk.f32.mxu0 %vm5893_vm1, %v5894_v21 }
 0x48f   :  { %5046 = vmatmul.mubr.f32.vlgmr.msra.gmra.mrb[6].mxu0 %v6189_v12  ;;  %v2468_v12 = vlaneseq }
 0x490   :  { %5416 = vmatpush3.bf16.msra.mxu0 %v5406_v7  ;;  %5048 = vmatprep.mubr.msk.f32.mxu0 %vm5893_vm1, %v5894_v21 }
 0x491   :  { %5058 = vmatprep.subr.mxu0 %v5894_v21 }
 0x493   :  { %5049 = vmatmul.mubr.f32.gmra.mrb[8].mxu0 %v6198_v0  ;;  %v6468_v0 = vshrl.u32 %v2468_v12, 7  ;;  %v3412_v12 = vld [vmem:[#allocation11 + $0x10] sm:$0xff] }
 0x494   :  { %5059 = vmatpush3.msra.mxu0 %v1916_v17  ;;  %5051 = vmatprep.mubr.msk.f32.mxu0 %vm5893_vm1, %v5894_v21 }
 0x495   :  { %5417 = vmatprep.subr.bf16.mxu0 %v5892_v11  ;;  %vm2957_vm4 = vcmp.eq.s32.totalorder %v4456_v63, %v6468_v0  ;;  %v3912_v63 = vld [vmem:[%s6626_s9 + $0x10] sm:$0xff] }
 0x496   :  { %v4457_v3 = vsel %vm2957_vm4, 1.0, %v5894_v21 }
 0x497   :  { %5052 = vmatmul.mubr.f32.gmra.mrb[10].mxu0 %v6204_v25  ;;  %v2962_v4 = vsel %vm2960_vm5, %v4457_v3, 0 }
 0x498   :  { %5060 = vmatprep.mubr.msk.f32.mxu0 %vm5893_vm1, %v5894_v21  ;;  %v3031_v5 = vsub.f32 %v2962_v4, %v2962_v4  ;;  %v3931_v4 = vand.u32 4294901760, %v3912_v63 }
 0x49a   :  { %v3032_v6 = vand.u32 4294901760, %v3031_v5 }
 0x49b   :  { %5061 = vmatmul.mubr.f32.vlgmr.msra.gmra.mrb[6].mxu0 %v6201_v19  ;;  %v4451_v19 = vld [vmem:[#allocation5] ss:$0 sm:$0xff] }
 0x49c   :  { %5419 = vmatpush3.bf16.msra.mxu0 %v5418_v23  ;;  %5063 = vmatprep.mubr.msk.f32.mxu0 %vm5893_vm1, %v5894_v21  ;;  %vm2474_vm3 = vcmp.eq.s32.totalorder %v4451_v19, %v6468_v0  ;;  %v3410_v23 = vld [vmem:[#allocation11] sm:$0xff]  ;;  %v3413_v0 = vld [vmem:[#allocation11 + $0x18] sm:$0xff]  ;;  %v3431_v19 = vand.u32 4294901760, %v3412_v12 }
 0x49d   :  { %5073 = vmatprep.subr.mxu0 %v5894_v21  ;;  %v3425_v1 = vand.u32 4294901760, %v3410_v23 }
 0x49f   :  { %5064 = vmatmul.mubr.f32.gmra.mrb[8].mxu0 %v6209_v26  ;;  %v3505_v29 = vsub.f32 %v3410_v23, %v3425_v1 }
 0x4a0   :  { %5074 = vmatpush3.msra.mxu0 %v2024_v27  ;;  %5066 = vmatprep.mubr.msk.f32.mxu0 %vm5893_vm1, %v5894_v21  ;;  %v3428_v27 = vand.u32 4294901760, %v3411_v24 }
 0x4a1   :  { %5420 = vmatprep.subr.bf16.mxu0 %v5892_v11 }
 0x4a2   :  { %v6533_v28 = vpack.c.bf16 %v3428_v27, %v3425_v1  ;;  %v3512_v30 = vsub.f32 %v3411_v24, %v3428_v27 }
 0x4a3   :  { %5067 = vmatmul.mubr.f32.gmra.mrb[10].mxu0 %v6222_v37 }
 0x4a4   :  { %5075 = vmatprep.mubr.msk.f32.mxu0 %vm5893_vm1, %v5894_v21 }
 0x4a7   :  { %5076 = vmatmul.mubr.f32.vlgmr.msra.gmra.mrb[6].mxu0 %v6184_v9 }
 0x4a8   :  { %5422 = vmatpush3.bf16.msra.mxu0 %v5406_v7  ;;  %5078 = vmatprep.mubr.msk.f32.mxu0 %vm5893_vm1, %v5894_v21  ;;  %v3033_v7 = vsub.f32 %v3031_v5, %v3032_v6 }
 0x4a9   :  { %5088 = vmatprep.subr.mxu0 %v5894_v21 }
 0x4aa   :  { %v3034_v15 = vand.u32 4294901760, %v3033_v7 }
 0x4ab   :  { %5079 = vmatmul.mubr.f32.gmra.mrb[8].mxu0 %v6191_v13 }
 0x4ac   :  { %5089 = vmatpush3.msra.mxu0 %v1916_v17  ;;  %5081 = vmatprep.mubr.msk.f32.mxu0 %vm5893_vm1, %v5894_v21 }
 0x4ad   :  { %5423 = vmatprep.subr.bf16.mxu0 %v5892_v11 }
 0x4af   :  { %5082 = vmatmul.mubr.f32.gmra.mrb[10].mxu0 %v6195_v18 }
 0x4b0   :  { %5090 = vmatprep.mubr.msk.f32.mxu0 %vm5893_vm1, %v5894_v21 }
 0x4b3   :  { %5091 = vmatmul.mubr.f32.vlgmr.msra.gmra.mrb[6].mxu0 %v6184_v9  ;;  %v4450_v9 = vld [vmem:[%s6623_s6 + $0x1] ss:$0 sm:$0xff] }
 0x4b4   :  { %5093 = vmatprep.mubr.msk.f32.mxu0 %vm5893_vm1, %v5894_v21 }
 0x4b7   :  { %5094 = vmatmul.mubr.f32.gmra.mrb[8].mxu0 %v6191_v13  ;;  %v6475_v13 = vsel %vm2474_vm3, 1.0, %v5894_v21 }
 0x4b8   :  { %5096 = vmatprep.mubr.msk.f32.mxu0 %vm5893_vm1, %v5894_v21 }
 0x4bb   :  { %5097 = vmatmul.mubr.f32.gmra.mrb[10].mxu0 %v6195_v18  ;;  %v2478_v18 = vsel %vm127_vm0, %v6475_v13, 0 }
 0x4bc   :  { %5105 = vmatprep.mubr.msk.f32.mxu0 %vm5893_vm1, %v5894_v21  ;;  %v2549_v48 = vsub.f32 %v2478_v18, %v2478_v18 }
 0x4be   :  { %v2550_v34 = vand.u32 4294901760, %v2549_v48 }
 0x4c0   :  { %v2551_v40 = vsub.f32 %v2549_v48, %v2550_v34 }
 0x4c2   :  { %v2552_v51 = vand.u32 4294901760, %v2551_v40 }
 0x586   :  { %v2451_v25 = vpop.f32.mrb[6].mxu0 }
 0x587   :  { %v5516_v26 = vadd.f32 %v4450_v9, %v2451_v25  ;;  %v5092_v35 = vpop.f32.mrb[7].mxu0  ;;  %v3506_v25 = vand.u32 4294901760, %v3505_v29 }
 0x588   :  { %v3519_v35 = vsub.f32 %v3412_v12, %v3431_v19 }
 0x589   :  { %v2481_v37 = vand.u32 4294901760, %v5516_v26 }
 0x58a   :  { %v2457_v44 = vpop.f32.mrb[8].mxu0 }
 0x58b   :  { %v2560_v31 = vsub.f32 %v5516_v26, %v2481_v37  ;;  %v5517_v32 = vadd.f32 %v4450_v9, %v2457_v44  ;;  %v5095_v33 = vpop.f32.mrb[9].mxu0 }
 0x58d   :  { %v2561_v36 = vand.u32 4294901760, %v2560_v31  ;;  %v2484_v38 = vand.u32 4294901760, %v5517_v32 }
 0x58e   :  { %v2463_v39 = vpop.f32.mrb[10].mxu0 }
 0x58f   :  { %v5424_v41 = vpack.c.bf16 %v2484_v38, %v2481_v37  ;;  %v2567_v42 = vsub.f32 %v5517_v32, %v2484_v38  ;;  %v5518_v43 = vadd.f32 %v4450_v9, %v2463_v39  ;;  %v5098_v45 = vpop.f32.mrb[11].mxu0  ;;  %v2562_v46 = vsub.f32 %v2560_v31, %v2561_v36 }
 0x590   :  { %v3434_v9 = vand.u32 4294901760, %v3413_v0  ;;  %v3507_v37 = vsub.f32 %v3505_v29, %v3506_v25 }
 0x591   :  { %v2568_v47 = vand.u32 4294901760, %v2567_v42  ;;  %v5430_v49 = vpack.c.bf16 %v2567_v42, %v2560_v31  ;;  %v2487_v50 = vand.u32 4294901760, %v5518_v43  ;;  %5425 = vmatpush3.bf16.msra.mxu0 %v5424_v41  ;;  %v2563_v56 = vand.u32 4294901760, %v2562_v46 }
 0x592   :  { %5103 = vmatprep.subr.mxu0 %v5894_v21  ;;  %v5445_v26 = vpack.c.bf16 %v3434_v9, %v3431_v19  ;;  %v3526_v18 = vsub.f32 %v3413_v0, %v3434_v9  ;;  %v3520_v31 = vand.u32 4294901760, %v3519_v35  ;;  %v4461_v9 = vld [vmem:[#allocation13] ss:$0 sm:$0xff] }
 0x593   :  { %v2569_v52 = vsub.f32 %v2567_v42, %v2568_v47  ;;  %v2574_v53 = vsub.f32 %v5518_v43, %v2487_v50  ;;  %v5436_v55 = vpack.c.bf16 %v2568_v47, %v2561_v36  ;;  %v5454_v42 = vpack.c.bf16 %v3512_v30, %v3505_v29 }
 0x594   :  { %v3527_v32 = vand.u32 4294901760, %v3526_v18  ;;  %v5457_v43 = vpack.c.bf16 %v3526_v18, %v3519_v35 }
 0x595   :  { %v2570_v57 = vand.u32 4294901760, %v2569_v52  ;;  %v2575_v58 = vand.u32 4294901760, %v2574_v53  ;;  %5104 = vmatpush3.msra.mxu0 %v2487_v50 }
 0x596   :  { %5106 = vmatmul.mubr.f32.vlgmr.msra.gmra.mrb[12].mxu0 %v2552_v51  ;;  %5153 = vmatprep.subr.mxu0 %v5894_v21  ;;  %v3528_v36 = vsub.f32 %v3526_v18, %v3527_v32  ;;  %v5469_v46 = vpack.c.bf16 %v3527_v32, %v3520_v31 }
 0x597   :  { %v2576_v59 = vsub.f32 %v2574_v53, %v2575_v58  ;;  %v5427_v60 = vpack.c.bf16 %v2570_v57, %v2563_v56  ;;  %5155 = vmatprep.mubr.msk.f32.mxu0 %vm5893_vm1, %v5894_v21  ;;  %v3910_v57 = vld [vmem:[%s6626_s9] sm:$0xff] }
 0x598   :  { %v3529_v40 = vand.u32 4294901760, %v3528_v36 }
 0x599   :  { %5428 = vmatpush3.bf16.msra.mxu1 %v5427_v60  ;;  %v2577_v54 = vand.u32 4294901760, %v2576_v59  ;;  %v3925_v59 = vand.u32 4294901760, %v3910_v57 }
 0x59a   :  { %5112 = vmatprep.subr.mxu1 %v5894_v21 }
 0x59d   :  { %5113 = vmatpush3.msra.mxu1 %v2577_v54 }
 0x59e   :  { %5115 = vmatmul.mubr.msk.f32.vlgmr.msra.gmra.mrb[12].mxu1 %vm127_vm0, %v6475_v13  ;;  %5429 = vmatprep.subr.bf16.mxu1 %v5892_v11 }
 0x59f   :  { %5431 = vmatpush3.bf16.msra.mxu1 %v5430_v49  ;;  %5123 = vmatprep.mubr.msk.f32.mxu1 %vm5893_vm1, %v5894_v21 }
 0x5a0   :  { %5121 = vmatprep.subr.mxu1 %v5894_v21 }
 0x5a3   :  { %5122 = vmatpush3.msra.mxu1 %v2574_v53 }
 0x5a4   :  { %5432 = vmatprep.subr.bf16.mxu1 %v5892_v11 }
 0x5a6   :  { %5124 = vmatmul.mubr.f32.vlgmr.msra.gmra.mrb[12].mxu1 %v2549_v48  ;;  %v3508_v48 = vand.u32 4294901760, %v3507_v37 }
 0x5a7   :  { %5434 = vmatpush3.bf16.msra.mxu1 %v5424_v41  ;;  %5132 = vmatprep.mubr.msk.f32.mxu1 %vm5893_vm1, %v5894_v21 }
 0x5a8   :  { %5130 = vmatprep.subr.mxu1 %v5894_v21 }
 0x5ab   :  { %5131 = vmatpush3.msra.mxu1 %v2487_v50 }
 0x5ac   :  { %5435 = vmatprep.subr.bf16.mxu1 %v5892_v11 }
 0x5ae   :  { %5133 = vmatmul.mubr.f32.vlgmr.msra.gmra.mrb[12].mxu1 %v2550_v34  ;;  %v3521_v34 = vsub.f32 %v3519_v35, %v3520_v31 }
 0x5af   :  { %5437 = vmatpush3.bf16.msra.mxu1 %v5436_v55  ;;  %5141 = vmatprep.mubr.msk.f32.mxu1 %vm5893_vm1, %v5894_v21 }
 0x5b0   :  { %5139 = vmatprep.subr.mxu1 %v5894_v21  ;;  %v3522_v39 = vand.u32 4294901760, %v3521_v34 }
 0x5b3   :  { %5140 = vmatpush3.msra.mxu1 %v2575_v58  ;;  %v3911_v58 = vld [vmem:[%s6626_s9 + $0x8] sm:$0xff] }
 0x5b4   :  { %5438 = vmatprep.subr.bf16.mxu1 %v5892_v11  ;;  %v3928_v60 = vand.u32 4294901760, %v3911_v58 }
 0x5b6   :  { %5142 = vmatmul.mubr.msk.f32.vlgmr.msra.gmra.mrb[12].mxu1 %vm127_vm0, %v6475_v13  ;;  %v6566_v54 = vpack.c.bf16 %v3928_v60, %v3925_v59 }
 0x5b7   :  { %5440 = vmatpush3.bf16.msra.mxu1 %v5424_v41  ;;  %5150 = vmatprep.mubr.msk.f32.mxu1 %vm5893_vm1, %v5894_v21  ;;  %v5451_v41 = vpack.c.bf16 %v3529_v40, %v3522_v39 }
 0x5b8   :  { %5148 = vmatprep.subr.mxu1 %v5894_v21 }
 0x5bb   :  { %5149 = vmatpush3.msra.mxu1 %v2487_v50 }
 0x5bc   :  { %5477 = vmatprep.subr.bf16.mxu1 %v5892_v11 }
 0x5be   :  { %5151 = vmatmul.mubr.msk.f32.vlgmr.msra.gmra.mrb[12].mxu1 %vm127_vm0, %v6475_v13  ;;  %v3513_v13 = vand.u32 4294901760, %v3512_v30 }
 0x5bf   :  { %5257 = vmatprep.mubr.msk.f32.mxu1 %vm5893_vm1, %v5894_v21  ;;  %5479 = vmatpush3.bf16.msra.mxu1 %v6566_v54 }
 0x5c0   :  { %v3514_v44 = vsub.f32 %v3512_v30, %v3513_v13  ;;  %v5466_v45 = vpack.c.bf16 %v3513_v13, %v3506_v25  ;;  %5480 = vmatprep.subr.bf16.mxu1 %v5892_v11 }
 0x5c2   :  { %v3515_v33 = vand.u32 4294901760, %v3514_v44 }
 0x5c4   :  { %v5448_v38 = vpack.c.bf16 %v3515_v33, %v3508_v48  ;;  %v4462_v33 = vld [vmem:[%s6627_s10] ss:$0 sm:$0xff]  ;;  %s5895_s10 = smov [#allocation14]  }
 0x5c5   :  { %s4430_s16 = sshll.u32 %s5895_s10, 4  ;;  %s4431_s16 = int_to_ptr.vmem [resolvable:$true] %s4430_s16 }
 0x5c6   :  { %s5851_s23 = scalar_lea.vmem %s4431_s16, 32  ;;  %p5856_p1 = scmp.lt.s32.totalorder %s4431_s16, %s4431_s16 }
 0x5c7   :  { %p5852_p0 = scmp.ne.s32.totalorder %s4431_s16, %s5851_s23  ;;  %p5857_p2 = scmp.lt.s32.totalorder %s5851_s23, %s5851_s23 }
 0x5c9   :  { %p5858_p3 = por %p5857_p2, %p5856_p1 }
 0x5cb   :  { %p5859_p4 = pnand %p5858_p3, %p5852_p0 }
 0x669   :  { %v2554_v61 = vpop.f32.mrb[12].mxu0 }
 0x66a   :  { %v5107_v62 = vpop.f32.mrb[13].mxu0 }
 0x66b   :  { %v4012_v62 = vsub.f32 %v3911_v58, %v3928_v60 }
 0x66d   :  { %v4013_v7 = vand.u32 4294901760, %v4012_v62 }
 0x691   :  { %v2948_v8 = vpop.f32.mrb[12].mxu1 }
 0x692   :  { %v5519_v10 = vadd.f32 %v2948_v8, %v2554_v61  ;;  %v5152_v14 = vpop.f32.mrb[13].mxu1  ;;  %v4005_v61 = vsub.f32 %v3910_v57, %v3925_v59 }
 0x694   :  { %v2965_v16 = vand.u32 4294901760, %v5519_v10  ;;  %v5490_v30 = vpack.c.bf16 %v4012_v62, %v4005_v61 }
 0x696   :  { %v3042_v17 = vsub.f32 %v5519_v10, %v2965_v16  ;;  %5154 = vmatpush3.msra.mxu0 %v2965_v16  ;;  %v4019_v10 = vsub.f32 %v3912_v63, %v3931_v4 }
 0x697   :  { %5156 = vmatmul.mubr.f32.vlgmr.msra.gmra.mrb[14].mxu0 %v3034_v15  ;;  %5158 = vmatprep.subr.mxu0 %v5894_v21 }
 0x698   :  { %v3043_v2 = vand.u32 4294901760, %v3042_v17  ;;  %5160 = vmatprep.mubr.msk.f32.mxu0 %vm5893_vm1, %v5894_v21 }
 0x69a   :  { %v3044_v20 = vsub.f32 %v3042_v17, %v3043_v2 }
 0x69c   :  { %v3045_v22 = vand.u32 4294901760, %v3044_v20 }
 0x69e   :  { %5159 = vmatpush3.msra.mxu0 %v3045_v22 }
 0x69f   :  { %5161 = vmatmul.mubr.msk.f32.vlgmr.msra.gmra.mrb[14].mxu0 %vm2960_vm5, %v4457_v3  ;;  %5163 = vmatprep.subr.mxu0 %v5894_v21 }
 0x6a0   :  { %5164 = vmatpush3.msra.mxu0 %v3042_v17  ;;  %5165 = vmatprep.mubr.msk.f32.mxu0 %vm5893_vm1, %v5894_v21 }
 0x6a1   :  { %5168 = vmatprep.subr.mxu0 %v5894_v21 }
 0x6a7   :  { %5166 = vmatmul.mubr.f32.vlgmr.msra.gmra.mrb[14].mxu0 %v3031_v5 }
 0x6a8   :  { %5169 = vmatpush3.msra.mxu0 %v2965_v16  ;;  %5170 = vmatprep.mubr.msk.f32.mxu0 %vm5893_vm1, %v5894_v21 }
 0x6a9   :  { %5173 = vmatprep.subr.mxu0 %v5894_v21 }
 0x6af   :  { %5171 = vmatmul.mubr.f32.vlgmr.msra.gmra.mrb[14].mxu0 %v3032_v6  ;;  %v4006_v6 = vand.u32 4294901760, %v4005_v61 }
 0x6b0   :  { %5174 = vmatpush3.msra.mxu0 %v3043_v2  ;;  %5175 = vmatprep.mubr.msk.f32.mxu0 %vm5893_vm1, %v5894_v21  ;;  %v4020_v2 = vand.u32 4294901760, %v4019_v10 }
 0x6b1   :  { %5178 = vmatprep.subr.mxu0 %v5894_v21  ;;  %v4007_v15 = vsub.f32 %v4005_v61, %v4006_v6  ;;  %v5502_v0 = vpack.c.bf16 %v4013_v7, %v4006_v6 }
 0x6b2   :  { %v4021_v23 = vsub.f32 %v4019_v10, %v4020_v2 }
 0x6b3   :  { %v4008_v17 = vand.u32 4294901760, %v4007_v15 }
 0x6b4   :  { %v4022_v27 = vand.u32 4294901760, %v4021_v23 }
 0x6b7   :  { %5176 = vmatmul.mubr.msk.f32.vlgmr.msra.gmra.mrb[14].mxu0 %vm2960_vm5, %v4457_v3 }
 0x6b8   :  { %5179 = vmatpush3.msra.mxu0 %v2965_v16  ;;  %5180 = vmatprep.mubr.msk.f32.mxu0 %vm5893_vm1, %v5894_v21  ;;  %v4014_v16 = vsub.f32 %v4012_v62, %v4013_v7 }
 0x6b9   :  { %5441 = vmatprep.subr.bf16.mxu0 %v5892_v11 }
 0x6ba   :  { %v4015_v22 = vand.u32 4294901760, %v4014_v16 }
 0x6bc   :  { %v5484_v1 = vpack.c.bf16 %v4015_v22, %v4008_v17 }
 0x6bf   :  { %5181 = vmatmul.mubr.msk.f32.vlgmr.msra.gmra.mrb[14].mxu0 %vm2960_vm5, %v4457_v3  ;;  %v3913_v3 = vld [vmem:[%s6626_s9 + $0x18] sm:$0xff] }
 0x6c0   :  { %5191 = vmatprep.mubr.msk.f32.mxu0 %vm5893_vm1, %v5894_v21  ;;  %5443 = vmatpush3.bf16.msra.mxu0 %v6533_v28  ;;  %v3934_v5 = vand.u32 4294901760, %v3913_v3 }
 0x6c1   :  { %5444 = vmatprep.subr.bf16.mxu0 %v5892_v11 }
 0x6c2   :  { %v5481_v8 = vpack.c.bf16 %v3934_v5, %v3931_v4  ;;  %v4026_v14 = vsub.f32 %v3913_v3, %v3934_v5 }
 0x6c4   :  { %5446 = vmatpush3.bf16.msra.mxu0 %v5445_v26  ;;  %5482 = vmatpush3.bf16.msra.mxu1 %v5481_v8  ;;  %v4027_v20 = vand.u32 4294901760, %v4026_v14  ;;  %v5493_v12 = vpack.c.bf16 %v4026_v14, %v4019_v10 }
 0x6c5   :  { %5447 = vmatprep.subr.bf16.mxu0 %v5892_v11  ;;  %5483 = vmatprep.subr.bf16.mxu1 %v5892_v11 }
 0x6c6   :  { %v4028_v24 = vsub.f32 %v4026_v14, %v4027_v20  ;;  %v5505_v19 = vpack.c.bf16 %v4027_v20, %v4020_v2 }
 0x792   :  { %v3406_v47 = vpop.f32.mrb[14].mxu0 }
 0x793   :  { %v3422_v49 = vsel %vm161_vm2, %v3406_v47, 0  ;;  %v5182_v50 = vpop.f32.mrb[15].mxu0 }
 0x794   :  { %v3493_v51 = vand.u32 4294901760, %v3422_v49 }
 0x796   :  { %v3494_v52 = vsub.f32 %v3422_v49, %v3493_v51 }
 0x798   :  { %v3495_v53 = vand.u32 4294901760, %v3494_v52 }
 0x79a   :  { %v3496_v55 = vsub.f32 %v3494_v52, %v3495_v53 }
 0x79c   :  { %v3497_v56 = vand.u32 4294901760, %v3496_v55 }
 0x79e   :  { %5192 = vmatmul.mubr.f32.vlgmr.msra.gmra.mrb[16].mxu0 %v3497_v56 }
 0x79f   :  { %5449 = vmatpush3.bf16.msra.mxu0 %v5448_v38  ;;  %5202 = vmatprep.mubr.msk.f32.mxu0 %vm5893_vm1, %v5894_v21 }
 0x7a0   :  { %5450 = vmatprep.subr.bf16.mxu0 %v5892_v11 }
 0x7a3   :  { %5452 = vmatpush3.bf16.msra.mxu0 %v5451_v41 }
 0x7a4   :  { %5453 = vmatprep.subr.bf16.mxu0 %v5892_v11 }
 0x7a6   :  { %5203 = vmatmul.mubr.f32.vlgmr.msra.gmra.mrb[16].mxu0 %v3493_v51 }
 0x7a7   :  { %5455 = vmatpush3.bf16.msra.mxu0 %v5454_v42  ;;  %5213 = vmatprep.mubr.msk.f32.mxu0 %vm5893_vm1, %v5894_v21 }
 0x7a8   :  { %5456 = vmatprep.subr.bf16.mxu0 %v5892_v11 }
 0x7ab   :  { %5458 = vmatpush3.bf16.msra.mxu0 %v5457_v43 }
 0x7ac   :  { %5459 = vmatprep.subr.bf16.mxu0 %v5892_v11 }
 0x7ae   :  { %5214 = vmatmul.mubr.f32.vlgmr.msra.gmra.mrb[16].mxu0 %v3494_v52 }
 0x7af   :  { %5461 = vmatpush3.bf16.msra.mxu0 %v6533_v28  ;;  %5224 = vmatprep.mubr.msk.f32.mxu0 %vm5893_vm1, %v5894_v21 }
 0x7b0   :  { %5462 = vmatprep.subr.bf16.mxu0 %v5892_v11 }
 0x7b3   :  { %5464 = vmatpush3.bf16.msra.mxu0 %v5445_v26 }
 0x7b4   :  { %5465 = vmatprep.subr.bf16.mxu0 %v5892_v11 }
 0x7b6   :  { %5225 = vmatmul.mubr.f32.vlgmr.msra.gmra.mrb[16].mxu0 %v3495_v53 }
 0x7b7   :  { %5467 = vmatpush3.bf16.msra.mxu0 %v5466_v45  ;;  %5235 = vmatprep.mubr.msk.f32.mxu0 %vm5893_vm1, %v5894_v21 }
 0x7b8   :  { %5468 = vmatprep.subr.bf16.mxu0 %v5892_v11 }
 0x7bb   :  { %5470 = vmatpush3.bf16.msra.mxu0 %v5469_v46 }
 0x7bc   :  { %5471 = vmatprep.subr.bf16.mxu0 %v5892_v11 }
 0x7be   :  { %5236 = vmatmul.mubr.f32.vlgmr.msra.gmra.mrb[16].mxu0 %v3493_v51 }
 0x7bf   :  { %5473 = vmatpush3.bf16.msra.mxu0 %v6533_v28  ;;  %5246 = vmatprep.mubr.msk.f32.mxu0 %vm5893_vm1, %v5894_v21  ;;  %v4029_v28 = vand.u32 4294901760, %v4028_v24 }
 0x7c0   :  { %5474 = vmatprep.subr.bf16.mxu0 %v5892_v11 }
 0x7c1   :  { %v5487_v29 = vpack.c.bf16 %v4029_v28, %v4022_v27 }
 0x7c3   :  { %5476 = vmatpush3.bf16.msra.mxu0 %v5445_v26 }
 0x7c6   :  { %5247 = vmatmul.mubr.f32.vlgmr.msra.gmra.mrb[16].mxu0 %v3493_v51 }
 0x899   :  { %v3905_v25 = vpop.f32.mrb[16].mxu0 }
 0x89a   :  { %v5520_v13 = vadd.f32 %v4461_v9, %v3905_v25  ;;  %v5248_v26 = vpop.f32.mrb[17].mxu0 }
 0x89c   :  { %v3909_v35 = vmax.f32 %v5520_v13, 0.0 }
 0x89e   :  { %v3922_v18 = vsel %vm161_vm2, %v3909_v35, 0 }
 0x89f   :  { %v3993_v37 = vand.u32 4294901760, %v3922_v18 }
 0x8a1   :  { %v3994_v44 = vsub.f32 %v3922_v18, %v3993_v37 }
 0x8a3   :  { %v3995_v48 = vand.u32 4294901760, %v3994_v44 }
 0x8a5   :  { %v3996_v31 = vsub.f32 %v3994_v44, %v3995_v48 }
 0x8a7   :  { %v3997_v32 = vand.u32 4294901760, %v3996_v31 }
 0x8a9   :  { %5258 = vmatmul.mubr.f32.vlgmr.msra.gmra.mrb[14].mxu1 %v3997_v32 }
 0x8aa   :  { %5485 = vmatpush3.bf16.msra.mxu1 %v5484_v1  ;;  %5268 = vmatprep.mubr.msk.f32.mxu1 %vm5893_vm1, %v5894_v21 }
 0x8ab   :  { %5486 = vmatprep.subr.bf16.mxu1 %v5892_v11 }
 0x8ae   :  { %5488 = vmatpush3.bf16.msra.mxu1 %v5487_v29 }
 0x8af   :  { %5489 = vmatprep.subr.bf16.mxu1 %v5892_v11 }
 0x8b1   :  { %5269 = vmatmul.mubr.f32.vlgmr.msra.gmra.mrb[14].mxu1 %v3993_v37 }
 0x8b2   :  { %5491 = vmatpush3.bf16.msra.mxu1 %v5490_v30  ;;  %5279 = vmatprep.mubr.msk.f32.mxu1 %vm5893_vm1, %v5894_v21 }
 0x8b3   :  { %5492 = vmatprep.subr.bf16.mxu1 %v5892_v11 }
 0x8b6   :  { %5494 = vmatpush3.bf16.msra.mxu1 %v5493_v12 }
 0x8b7   :  { %5495 = vmatprep.subr.bf16.mxu1 %v5892_v11 }
 0x8b9   :  { %5280 = vmatmul.mubr.f32.vlgmr.msra.gmra.mrb[14].mxu1 %v3994_v44 }
 0x8ba   :  { %5497 = vmatpush3.bf16.msra.mxu1 %v6566_v54  ;;  %5290 = vmatprep.mubr.msk.f32.mxu1 %vm5893_vm1, %v5894_v21 }
 0x8bb   :  { %5498 = vmatprep.subr.bf16.mxu1 %v5892_v11 }
 0x8be   :  { %5500 = vmatpush3.bf16.msra.mxu1 %v5481_v8 }
 0x8bf   :  { %5501 = vmatprep.subr.bf16.mxu1 %v5892_v11 }
 0x8c1   :  { %5291 = vmatmul.mubr.f32.vlgmr.msra.gmra.mrb[14].mxu1 %v3995_v48 }
 0x8c2   :  { %5503 = vmatpush3.bf16.msra.mxu1 %v5502_v0  ;;  %5301 = vmatprep.mubr.msk.f32.mxu1 %vm5893_vm1, %v5894_v21 }
 0x8c3   :  { %5504 = vmatprep.subr.bf16.mxu1 %v5892_v11 }
 0x8c6   :  { %5506 = vmatpush3.bf16.msra.mxu1 %v5505_v19 }
 0x8c7   :  { %5507 = vmatprep.subr.bf16.mxu1 %v5892_v11 }
 0x8c9   :  { %5302 = vmatmul.mubr.f32.vlgmr.msra.gmra.mrb[14].mxu1 %v3993_v37 }
 0x8ca   :  { %5509 = vmatpush3.bf16.msra.mxu1 %v6566_v54  ;;  %5312 = vmatprep.mubr.msk.f32.mxu1 %vm5893_vm1, %v5894_v21 }
 0x8cb   :  { %5510 = vmatprep.subr.bf16.mxu1 %v5892_v11 }
 0x8ce   :  { %5512 = vmatpush3.bf16.msra.mxu1 %v5481_v8 }
 0x8d1   :  { %5313 = vmatmul.mubr.f32.vlgmr.msra.gmra.mrb[14].mxu1 %v3993_v37 }
 0x9a4   :  { %v4405_v34 = vpop.f32.mrb[14].mxu1 }
 0x9a5   :  { %v5521_v36 = vadd.f32 %v4462_v33, %v4405_v34  ;;  %v5314_v38 = vpop.f32.mrb[15].mxu1 }
 0x9a7   :  { %v4410_v39 = vsel %vm4409_vm6, %v5521_v36, -inf }
 0x9a8   :  { %4411 = vmax.xlane.f32.xlu1 %v4410_v39 }
 0xa35   :  { %v4412_v40 = vpop.xlane.xlu1 %4411 }
 0xa36   :  { %v4413_v41 = vsub.f32 %v5521_v36, %v4412_v40 }
 0xa38   :  { %v4414_v42 = vmul.f32 1.442695, %v4413_v41 }
 0xa3a   :  { %5693 = vpow2.f32 %v4414_v42 }
 0xa44   :  { %v5694_v21 = vpop.eup %5693 }
 0xa45   :  { %v4416_v11 = vsel %vm4409_vm6, %v5694_v21, 0.0 }
 0xa46   :  { %4417 = vadd.xlane.f32.xlu0 %v4416_v11 }
 0xad3   :  { %v4418_v43 = vpop.xlane.xlu0 %4417 }
 0xad4   :  { %5695 = vlog2.f32 %v4418_v43 }
 0xade   :  { %v5696_v45 = vpop.eup %5695 }
 0xadf   :  { %v4420_v46 = vmul.f32 0.6931472, %v5696_v45 }
 0xae1   :  { %v4421_v47 = vadd.f32 %v4420_v46, %v4412_v40 }
 0xae3   :  { %v4422_v49 = vsub.f32 %v5521_v36, %v4421_v47 }
 0xae5   :  { %4423 = vst.msk [vmem:[#allocation14] sm:$0x3] %vm4409_vm6, %v4422_v49 }
 0xae6   :  { %5862 = shalt.err (!%p5859_p4)
}
 0xae7   :  { %s5863_s24 = scalar_lea.hbm %s6628_s11, 32 }
 0xae8   :  { %p5864_p5 = scmp.ne.s32.totalorder %s6628_s11, %s5863_s24  ;;  %p5867_p6 = scmp.lt.u32.totalorder %s5863_s24, %s6628_s11 }
 0xaea   :  { %p5869_p7 = pnand %p5867_p6, %p5864_p5 }
 0xaec   :  { %5872 = shalt.err (!%p5869_p7)
}
 0xaed   :  { %4433 = dma.vmem_to_hbm [thread:$0]  %s4431_s16, 32, %s6628_s11, [#allocation4]  }
 0xaee   :  { %5881 = dma.done.wait [#allocation4], 32  }
 0xaef   :  { %5882 = vsyncadd [#allocation4], 4294967264 }
 0xaf0   :  { %4437 = vsyncpa [#allocation3], 1 }
 0xaf1   :  { %4438 = vsyncpa [#allocation6], 1 }
 0xaf2   :  { %4439 = vsyncpa [#allocation9], 1 }
 0xaf3   :  { %4440 = vsyncpa [#allocation12], 1 }
 0xaf4   :  { %4441 = vsyncpa [#allocation4], 1 }

</bundles_post_ra>
